<compile_context>
chip_gen: v7x
topology: tpu7x:2x2x1
jax: 0.10.0
libtpu: 0.0.40
codegen_flags: <defaults>
</compile_context>

<pallas_src>
import math

import jax
import jax.numpy as jnp
from jax.experimental import pallas as pl
from jax.experimental.pallas import tpu as pltpu


# ----------------------------------------------------------------------------
# Wrapper-side prep: stride-phase space-to-depth (NO kh*kw expansion)
# ----------------------------------------------------------------------------
def _phase_decompose(x, kh, kw, sh, sw, ph, pw):
    """phases[b, (ri*sw + rj)*Cin + ci, a, t] == xpad[b, ci, a*sh + ri, t*sw + rj]

    Pure relayout of the zero-padded input: same number of elements as the
    input, so the HBM stream feeding the kernel is ~input-sized.  The kh*kw
    window gathering happens inside the kernel from VMEM.
    """
    B, Cin, D, T = x.shape
    d_out = (D + 2 * ph - kh) // sh + 1
    t_out = (T + 2 * pw - kw) // sw + 1
    dph = d_out + (kh - 1) // sh          # phase rows the kernel will index
    tph = t_out + (kw - 1) // sw
    dpad, tpad = dph * sh, tph * sw
    xp = jnp.pad(x, ((0, 0), (0, 0),
                     (ph, max(0, dpad - D - ph)),
                     (pw, max(0, tpad - T - pw))))[:, :, :dpad, :tpad]
    phases = xp.reshape(B, Cin, dph, sh, tph, sw).transpose(0, 3, 5, 1, 2, 4)
    phases = phases.reshape(B, sh * sw * Cin, dph, tph)
    return phases, d_out, t_out, dph, tph


# ----------------------------------------------------------------------------
# Fused kernel: in-VMEM im2col + conv accumulate + (bias/BN) shift + Hardtanh
#               + per-length time mask, all in one grid-less pallas_call.
# ----------------------------------------------------------------------------
def mask_conv_forward(x, lengths, params):
    """MaskConv.forward: Conv2d -> mask -> BatchNorm2d -> mask -> Hardtanh -> mask.

    (Masking only once at the end is algebraically identical, since BN-eval and
    Hardtanh are elementwise and masked positions end up 0 either way.)
    """
    W, bconv = params["W"], params["b"]
    sh, sw = params["stride"]
    ph, pw = params["padding"]
    bn_scale, bn_shift = params["bn_scale"], params["bn_shift"]

    B, Cin, D, T = x.shape
    Cout, _, kh, kw = W.shape

    phases, d_out, t_out, dph, tph = _phase_decompose(x, kh, kw, sh, sw, ph, pw)

    # Fold eval-mode BN into the weights and the conv bias into a shift:
    #   scale*(conv(x, W) + b) + beta == conv(x, W*scale) + (b*scale + beta)
    w_flat = (W * bn_scale[:, None, None, None]).astype(jnp.float32).reshape(-1)
    shift = (bconv * bn_scale + bn_shift).astype(jnp.float32)      # (Cout,)

    def kernel(lens_ref, ph_ref, w_ref, shift_ref, o_ref):
        # lens_ref : (B,)                     int32  SMEM  (valid time lengths)
        # ph_ref   : (B, sh*sw*Cin, dph, tph) f32    VMEM  (phase slabs)
        # w_ref    : (Cout*Cin*kh*kw,)        f32    SMEM  (bn_scale folded in)
        # shift_ref: (Cout,)                  f32    SMEM
        # o_ref    : (B, Cout, d_out, t_out)  bf16   VMEM
        t_idx = jax.lax.broadcasted_iota(jnp.int32, (d_out, t_out), 1)
        for b in range(B):                      # unrolled; single grid step
            keep = t_idx < lens_ref[b]
            # Gather the Cin*kh*kw shifted windows once per batch element
            # (reused by every output channel).  Static contiguous slices:
            #   xpad[ci, do*sh + i, to*sw + j]
            #     == phases[(i%sh)*sw + (j%sw), ci][do + i//sh, to + j//sw]
            slabs = []
            for ci in range(Cin):
                for i in range(kh):
                    for j in range(kw):
                        p = ((i % sh) * sw + (j % sw)) * Cin + ci
                        qi, qj = i // sh, j // sw
                        slabs.append(
                            ph_ref[b, p, qi:qi + d_out, qj:qj + t_out])
            for co in range(Cout):
                acc = jnp.zeros((d_out, t_out), jnp.float32)
                s = 0
                for ci in range(Cin):
                    for i in range(kh):
                        for j in range(kw):
                            widx = ((co * Cin + ci) * kh + i) * kw + j
                            acc = acc + w_ref[widx] * slabs[s]   # scalar splat
                            s += 1
                y = jnp.clip(acc + shift_ref[co], 0.0, 20.0)     # bias/BN + htanh
                o_ref[b, co, :, :] = jnp.where(keep, y, 0.0).astype(o_ref.dtype)

    out = pl.pallas_call(
        kernel,
        out_shape=jax.ShapeDtypeStruct((B, Cout, d_out, t_out), jnp.bfloat16),
        in_specs=[
            pl.BlockSpec(memory_space=pltpu.MemorySpace.SMEM),   # lengths
            pl.BlockSpec(memory_space=pltpu.MemorySpace.VMEM),   # phases
            pl.BlockSpec(memory_space=pltpu.MemorySpace.SMEM),   # folded weights
            pl.BlockSpec(memory_space=pltpu.MemorySpace.SMEM),   # shift
        ],
        out_specs=pl.BlockSpec(memory_space=pltpu.MemorySpace.VMEM),
        compiler_params=pltpu.CompilerParams(
            vmem_limit_bytes=4 * 1024 * 1024,   # actual use ~130 KiB + headroom
        ),
    )(lengths.astype(jnp.int32), phases, w_flat, shift)

    return out, lengths


# ----------------------------------------------------------------------------
# Main
# ----------------------------------------------------------------------------
if __name__ == "__main__":
    # Input [B, C, D, T] = [2, 1, 16, 16]; conv 1->8, k=(3,3), s=(2,2), p=(1,1).
    B, Cin, D, T = 2, 1, 16, 16
    Cout, kh, kw = 8, 3, 3
    stride, padding = (2, 2), (1, 1)

    key = jax.random.PRNGKey(0)
    k_x, k_w, k_b, k_g, k_be = jax.random.split(key, 5)

    x = jax.random.normal(k_x, (B, Cin, D, T), jnp.float32)

    # Deterministic synthetic parameters (no checkpoint).
    W = jax.random.normal(k_w, (Cout, Cin, kh, kw), jnp.float32) / math.sqrt(Cin * kh * kw)
    bconv = 0.1 * jax.random.normal(k_b, (Cout,), jnp.float32)
    gamma = 1.0 + 0.1 * jax.random.normal(k_g, (Cout,), jnp.float32)
    beta = 0.1 * jax.random.normal(k_be, (Cout,), jnp.float32)
    running_mean = jnp.zeros((Cout,), jnp.float32)
    running_var = jnp.ones((Cout,), jnp.float32)
    eps = 1e-5
    bn_scale = gamma / jnp.sqrt(running_var + eps)          # (Cout,)
    bn_shift = beta - running_mean * bn_scale               # (Cout,)

    params = dict(W=W, b=bconv, stride=stride, padding=padding,
                  bn_scale=bn_scale, bn_shift=bn_shift)

    # Post-conv valid time lengths (T_out = 8 here), as in MaskConv.
    lengths = jnp.array([8, 5], dtype=jnp.int32)

    out, out_lengths = mask_conv_forward(x, lengths, params)
    out = jax.block_until_ready(out)

    # Pure-JAX f32 reference applying the three masked stages sequentially,
    # exactly like MaskConv.forward (kernel output is bf16-rounded).
    conv = jax.lax.conv_general_dilated(
        x, W, window_strides=stride,
        padding=[(padding[0], padding[0]), (padding[1], padding[1])],
        dimension_numbers=("NCHW", "OIHW", "NCHW"))
    conv = conv + bconv[None, :, None, None]
    d_out = (D + 2 * padding[0] - kh) // stride[0] + 1
    t_out = (T + 2 * padding[1] - kw) // stride[1] + 1
    tmask = (jnp.arange(t_out, dtype=jnp.int32)[None, None, None, :]
             >= lengths[:, None, None, None])
    ref = jnp.where(tmask, 0.0, conv)                                   # conv  -> mask
    ref = jnp.where(tmask, 0.0,
                    ref * bn_scale[None, :, None, None]
                    + bn_shift[None, :, None, None])                    # BN    -> mask
    ref = jnp.where(tmask, 0.0, jnp.clip(ref, 0.0, 20.0))               # htanh -> mask

    assert out.shape == (B, Cout, d_out, t_out), out.shape
    assert jnp.allclose(out.astype(jnp.float32), ref, atol=1e-2, rtol=1e-2), \
        "mismatch vs reference"
    print("KERNEL_OK")
</pallas_src>

<mosaic_0001>
module attributes {stable_mosaic.version = 11 : i64} {
  func.func @kernel(%arg0: memref<2xi32, #tpu.memory_space<smem>>, %arg1: memref<2x4x9x9xf32, #tpu.memory_space<vmem>>, %arg2: memref<72xf32, #tpu.memory_space<smem>>, %arg3: memref<8xf32, #tpu.memory_space<smem>>, %arg4: memref<2x8x8x8xbf16, #tpu.memory_space<vmem>>) attributes {dimension_semantics = [], scalar_prefetch = 0 : i64, scratch_operands = 0 : i64, tpu.core_type = #tpu.core_type<tc>} {
    %0 = tpu.iota {dimensions = array<i32: 1>} : vector<8x8xi32>
    %c0 = arith.constant 0 : index
    %1 = memref.load %arg0[%c0] : memref<2xi32, #tpu.memory_space<smem>>
    %2 = vector.broadcast %1 : i32 to vector<8x8xi32>
    %3 = arith.cmpi slt, %0, %2 : vector<8x8xi32>
    %c0_0 = arith.constant 0 : index
    %c0_1 = arith.constant 0 : index
    %c0_2 = arith.constant 0 : index
    %c0_3 = arith.constant 0 : index
    %4 = vector.load %arg1[%c0_0, %c0_1, %c0_2, %c0_3] : memref<2x4x9x9xf32, #tpu.memory_space<vmem>>, vector<1x1x8x8xf32>
    %5 = vector.shape_cast %4 : vector<1x1x8x8xf32> to vector<8x8xf32>
    %c0_4 = arith.constant 0 : index
    %c1 = arith.constant 1 : index
    %c0_5 = arith.constant 0 : index
    %c0_6 = arith.constant 0 : index
    %6 = vector.load %arg1[%c0_4, %c1, %c0_5, %c0_6] : memref<2x4x9x9xf32, #tpu.memory_space<vmem>>, vector<1x1x8x8xf32>
    %7 = vector.shape_cast %6 : vector<1x1x8x8xf32> to vector<8x8xf32>
    %c0_7 = arith.constant 0 : index
    %c0_8 = arith.constant 0 : index
    %c0_9 = arith.constant 0 : index
    %c1_10 = arith.constant 1 : index
    %8 = vector.load %arg1[%c0_7, %c0_8, %c0_9, %c1_10] : memref<2x4x9x9xf32, #tpu.memory_space<vmem>>, vector<1x1x8x8xf32>
    %9 = vector.shape_cast %8 : vector<1x1x8x8xf32> to vector<8x8xf32>
    %c0_11 = arith.constant 0 : index
    %c2 = arith.constant 2 : index
    %c0_12 = arith.constant 0 : index
    %c0_13 = arith.constant 0 : index
    %10 = vector.load %arg1[%c0_11, %c2, %c0_12, %c0_13] : memref<2x4x9x9xf32, #tpu.memory_space<vmem>>, vector<1x1x8x8xf32>
    %11 = vector.shape_cast %10 : vector<1x1x8x8xf32> to vector<8x8xf32>
    %c0_14 = arith.constant 0 : index
    %c3 = arith.constant 3 : index
    %c0_15 = arith.constant 0 : index
    %c0_16 = arith.constant 0 : index
    %12 = vector.load %arg1[%c0_14, %c3, %c0_15, %c0_16] : memref<2x4x9x9xf32, #tpu.memory_space<vmem>>, vector<1x1x8x8xf32>
    %13 = vector.shape_cast %12 : vector<1x1x8x8xf32> to vector<8x8xf32>
    %c0_17 = arith.constant 0 : index
    %c2_18 = arith.constant 2 : index
    %c0_19 = arith.constant 0 : index
    %c1_20 = arith.constant 1 : index
    %14 = vector.load %arg1[%c0_17, %c2_18, %c0_19, %c1_20] : memref<2x4x9x9xf32, #tpu.memory_space<vmem>>, vector<1x1x8x8xf32>
    %15 = vector.shape_cast %14 : vector<1x1x8x8xf32> to vector<8x8xf32>
    %c0_21 = arith.constant 0 : index
    %c0_22 = arith.constant 0 : index
    %c1_23 = arith.constant 1 : index
    %c0_24 = arith.constant 0 : index
    %16 = vector.load %arg1[%c0_21, %c0_22, %c1_23, %c0_24] : memref<2x4x9x9xf32, #tpu.memory_space<vmem>>, vector<1x1x8x8xf32>
    %17 = vector.shape_cast %16 : vector<1x1x8x8xf32> to vector<8x8xf32>
    %c0_25 = arith.constant 0 : index
    %c1_26 = arith.constant 1 : index
    %c1_27 = arith.constant 1 : index
    %c0_28 = arith.constant 0 : index
    %18 = vector.load %arg1[%c0_25, %c1_26, %c1_27, %c0_28] : memref<2x4x9x9xf32, #tpu.memory_space<vmem>>, vector<1x1x8x8xf32>
    %19 = vector.shape_cast %18 : vector<1x1x8x8xf32> to vector<8x8xf32>
    %c0_29 = arith.constant 0 : index
    %c0_30 = arith.constant 0 : index
    %c1_31 = arith.constant 1 : index
    %c1_32 = arith.constant 1 : index
    %20 = vector.load %arg1[%c0_29, %c0_30, %c1_31, %c1_32] : memref<2x4x9x9xf32, #tpu.memory_space<vmem>>, vector<1x1x8x8xf32>
    %21 = vector.shape_cast %20 : vector<1x1x8x8xf32> to vector<8x8xf32>
    %cst = arith.constant 0.000000e+00 : f32
    %22 = vector.broadcast %cst : f32 to vector<8x8xf32>
    %c0_33 = arith.constant 0 : index
    %23 = memref.load %arg2[%c0_33] : memref<72xf32, #tpu.memory_space<smem>>
    %24 = vector.broadcast %23 : f32 to vector<8x8xf32>
    %25 = arith.mulf %24, %5 : vector<8x8xf32>
    %26 = arith.addf %22, %25 : vector<8x8xf32>
    %c1_34 = arith.constant 1 : index
    %27 = memref.load %arg2[%c1_34] : memref<72xf32, #tpu.memory_space<smem>>
    %28 = vector.broadcast %27 : f32 to vector<8x8xf32>
    %29 = arith.mulf %28, %7 : vector<8x8xf32>
    %30 = arith.addf %26, %29 : vector<8x8xf32>
    %c2_35 = arith.constant 2 : index
    %31 = memref.load %arg2[%c2_35] : memref<72xf32, #tpu.memory_space<smem>>
    %32 = vector.broadcast %31 : f32 to vector<8x8xf32>
    %33 = arith.mulf %32, %9 : vector<8x8xf32>
    %34 = arith.addf %30, %33 : vector<8x8xf32>
    %c3_36 = arith.constant 3 : index
    %35 = memref.load %arg2[%c3_36] : memref<72xf32, #tpu.memory_space<smem>>
    %36 = vector.broadcast %35 : f32 to vector<8x8xf32>
    %37 = arith.mulf %36, %11 : vector<8x8xf32>
    %38 = arith.addf %34, %37 : vector<8x8xf32>
    %c4 = arith.constant 4 : index
    %39 = memref.load %arg2[%c4] : memref<72xf32, #tpu.memory_space<smem>>
    %40 = vector.broadcast %39 : f32 to vector<8x8xf32>
    %41 = arith.mulf %40, %13 : vector<8x8xf32>
    %42 = arith.addf %38, %41 : vector<8x8xf32>
    %c5 = arith.constant 5 : index
    %43 = memref.load %arg2[%c5] : memref<72xf32, #tpu.memory_space<smem>>
    %44 = vector.broadcast %43 : f32 to vector<8x8xf32>
    %45 = arith.mulf %44, %15 : vector<8x8xf32>
    %46 = arith.addf %42, %45 : vector<8x8xf32>
    %c6 = arith.constant 6 : index
    %47 = memref.load %arg2[%c6] : memref<72xf32, #tpu.memory_space<smem>>
    %48 = vector.broadcast %47 : f32 to vector<8x8xf32>
    %49 = arith.mulf %48, %17 : vector<8x8xf32>
    %50 = arith.addf %46, %49 : vector<8x8xf32>
    %c7 = arith.constant 7 : index
    %51 = memref.load %arg2[%c7] : memref<72xf32, #tpu.memory_space<smem>>
    %52 = vector.broadcast %51 : f32 to vector<8x8xf32>
    %53 = arith.mulf %52, %19 : vector<8x8xf32>
    %54 = arith.addf %50, %53 : vector<8x8xf32>
    %c8 = arith.constant 8 : index
    %55 = memref.load %arg2[%c8] : memref<72xf32, #tpu.memory_space<smem>>
    %56 = vector.broadcast %55 : f32 to vector<8x8xf32>
    %57 = arith.mulf %56, %21 : vector<8x8xf32>
    %58 = arith.addf %54, %57 : vector<8x8xf32>
    %c0_37 = arith.constant 0 : index
    %59 = memref.load %arg3[%c0_37] : memref<8xf32, #tpu.memory_space<smem>>
    %60 = vector.broadcast %59 : f32 to vector<8x8xf32>
    %61 = arith.addf %58, %60 : vector<8x8xf32>
    %cst_38 = arith.constant 0.000000e+00 : f32
    %cst_39 = arith.constant 2.000000e+01 : f32
    %62 = vector.broadcast %cst_38 : f32 to vector<8x8xf32>
    %63 = arith.maximumf %62, %61 : vector<8x8xf32>
    %64 = vector.broadcast %cst_39 : f32 to vector<8x8xf32>
    %65 = arith.minimumf %64, %63 : vector<8x8xf32>
    %cst_40 = arith.constant 0.000000e+00 : f32
    %66 = vector.broadcast %cst_40 : f32 to vector<8x8xf32>
    %67 = arith.select %3, %65, %66 : vector<8x8xi1>, vector<8x8xf32>
    %68 = arith.truncf %67 : vector<8x8xf32> to vector<8x8xbf16>
    %c0_41 = arith.constant 0 : index
    %c0_42 = arith.constant 0 : index
    %c0_43 = arith.constant 0 : index
    %c0_44 = arith.constant 0 : index
    %69 = vector.load %arg4[%c0_41, %c0_42, %c0_43, %c0_44] : memref<2x8x8x8xbf16, #tpu.memory_space<vmem>>, vector<1x1x8x8xbf16>
    %70 = vector.shape_cast %69 : vector<1x1x8x8xbf16> to vector<8x8xbf16>
    %71 = vector.shape_cast %68 : vector<8x8xbf16> to vector<1x1x8x8xbf16>
    tpu.vector_store %arg4[%c0_41, %c0_42, %c0_43, %c0_44], %71 {strides = array<i32>} : memref<2x8x8x8xbf16, #tpu.memory_space<vmem>>, vector<1x1x8x8xbf16>,
    %cst_45 = arith.constant 0.000000e+00 : f32
    %72 = vector.broadcast %cst_45 : f32 to vector<8x8xf32>
    %c9 = arith.constant 9 : index
    %73 = memref.load %arg2[%c9] : memref<72xf32, #tpu.memory_space<smem>>
    %74 = vector.broadcast %73 : f32 to vector<8x8xf32>
    %75 = arith.mulf %74, %5 : vector<8x8xf32>
    %76 = arith.addf %72, %75 : vector<8x8xf32>
    %c10 = arith.constant 10 : index
    %77 = memref.load %arg2[%c10] : memref<72xf32, #tpu.memory_space<smem>>
    %78 = vector.broadcast %77 : f32 to vector<8x8xf32>
    %79 = arith.mulf %78, %7 : vector<8x8xf32>
    %80 = arith.addf %76, %79 : vector<8x8xf32>
    %c11 = arith.constant 11 : index
    %81 = memref.load %arg2[%c11] : memref<72xf32, #tpu.memory_space<smem>>
    %82 = vector.broadcast %81 : f32 to vector<8x8xf32>
    %83 = arith.mulf %82, %9 : vector<8x8xf32>
    %84 = arith.addf %80, %83 : vector<8x8xf32>
    %c12 = arith.constant 12 : index
    %85 = memref.load %arg2[%c12] : memref<72xf32, #tpu.memory_space<smem>>
    %86 = vector.broadcast %85 : f32 to vector<8x8xf32>
    %87 = arith.mulf %86, %11 : vector<8x8xf32>
    %88 = arith.addf %84, %87 : vector<8x8xf32>
    %c13 = arith.constant 13 : index
    %89 = memref.load %arg2[%c13] : memref<72xf32, #tpu.memory_space<smem>>
    %90 = vector.broadcast %89 : f32 to vector<8x8xf32>
    %91 = arith.mulf %90, %13 : vector<8x8xf32>
    %92 = arith.addf %88, %91 : vector<8x8xf32>
    %c14 = arith.constant 14 : index
    %93 = memref.load %arg2[%c14] : memref<72xf32, #tpu.memory_space<smem>>
    %94 = vector.broadcast %93 : f32 to vector<8x8xf32>
    %95 = arith.mulf %94, %15 : vector<8x8xf32>
    %96 = arith.addf %92, %95 : vector<8x8xf32>
    %c15 = arith.constant 15 : index
    %97 = memref.load %arg2[%c15] : memref<72xf32, #tpu.memory_space<smem>>
    %98 = vector.broadcast %97 : f32 to vector<8x8xf32>
    %99 = arith.mulf %98, %17 : vector<8x8xf32>
    %100 = arith.addf %96, %99 : vector<8x8xf32>
    %c16 = arith.constant 16 : index
    %101 = memref.load %arg2[%c16] : memref<72xf32, #tpu.memory_space<smem>>
    %102 = vector.broadcast %101 : f32 to vector<8x8xf32>
    %103 = arith.mulf %102, %19 : vector<8x8xf32>
    %104 = arith.addf %100, %103 : vector<8x8xf32>
    %c17 = arith.constant 17 : index
    %105 = memref.load %arg2[%c17] : memref<72xf32, #tpu.memory_space<smem>>
    %106 = vector.broadcast %105 : f32 to vector<8x8xf32>
    %107 = arith.mulf %106, %21 : vector<8x8xf32>
    %108 = arith.addf %104, %107 : vector<8x8xf32>
    %c1_46 = arith.constant 1 : index
    %109 = memref.load %arg3[%c1_46] : memref<8xf32, #tpu.memory_space<smem>>
    %110 = vector.broadcast %109 : f32 to vector<8x8xf32>
    %111 = arith.addf %108, %110 : vector<8x8xf32>
    %cst_47 = arith.constant 0.000000e+00 : f32
    %cst_48 = arith.constant 2.000000e+01 : f32
    %112 = vector.broadcast %cst_47 : f32 to vector<8x8xf32>
    %113 = arith.maximumf %112, %111 : vector<8x8xf32>
    %114 = vector.broadcast %cst_48 : f32 to vector<8x8xf32>
    %115 = arith.minimumf %114, %113 : vector<8x8xf32>
    %cst_49 = arith.constant 0.000000e+00 : f32
    %116 = vector.broadcast %cst_49 : f32 to vector<8x8xf32>
    %117 = arith.select %3, %115, %116 : vector<8x8xi1>, vector<8x8xf32>
    %118 = arith.truncf %117 : vector<8x8xf32> to vector<8x8xbf16>
    %c0_50 = arith.constant 0 : index
    %c1_51 = arith.constant 1 : index
    %c0_52 = arith.constant 0 : index
    %c0_53 = arith.constant 0 : index
    %119 = vector.load %arg4[%c0_50, %c1_51, %c0_52, %c0_53] : memref<2x8x8x8xbf16, #tpu.memory_space<vmem>>, vector<1x1x8x8xbf16>
    %120 = vector.shape_cast %119 : vector<1x1x8x8xbf16> to vector<8x8xbf16>
    %121 = vector.shape_cast %118 : vector<8x8xbf16> to vector<1x1x8x8xbf16>
    tpu.vector_store %arg4[%c0_50, %c1_51, %c0_52, %c0_53], %121 {strides = array<i32>} : memref<2x8x8x8xbf16, #tpu.memory_space<vmem>>, vector<1x1x8x8xbf16>,
    %cst_54 = arith.constant 0.000000e+00 : f32
    %122 = vector.broadcast %cst_54 : f32 to vector<8x8xf32>
    %c18 = arith.constant 18 : index
    %123 = memref.load %arg2[%c18] : memref<72xf32, #tpu.memory_space<smem>>
    %124 = vector.broadcast %123 : f32 to vector<8x8xf32>
    %125 = arith.mulf %124, %5 : vector<8x8xf32>
    %126 = arith.addf %122, %125 : vector<8x8xf32>
    %c19 = arith.constant 19 : index
    %127 = memref.load %arg2[%c19] : memref<72xf32, #tpu.memory_space<smem>>
    %128 = vector.broadcast %127 : f32 to vector<8x8xf32>
    %129 = arith.mulf %128, %7 : vector<8x8xf32>
    %130 = arith.addf %126, %129 : vector<8x8xf32>
    %c20 = arith.constant 20 : index
    %131 = memref.load %arg2[%c20] : memref<72xf32, #tpu.memory_space<smem>>
    %132 = vector.broadcast %131 : f32 to vector<8x8xf32>
    %133 = arith.mulf %132, %9 : vector<8x8xf32>
    %134 = arith.addf %130, %133 : vector<8x8xf32>
    %c21 = arith.constant 21 : index
    %135 = memref.load %arg2[%c21] : memref<72xf32, #tpu.memory_space<smem>>
    %136 = vector.broadcast %135 : f32 to vector<8x8xf32>
    %137 = arith.mulf %136, %11 : vector<8x8xf32>
    %138 = arith.addf %134, %137 : vector<8x8xf32>
    %c22 = arith.constant 22 : index
    %139 = memref.load %arg2[%c22] : memref<72xf32, #tpu.memory_space<smem>>
    %140 = vector.broadcast %139 : f32 to vector<8x8xf32>
    %141 = arith.mulf %140, %13 : vector<8x8xf32>
    %142 = arith.addf %138, %141 : vector<8x8xf32>
    %c23 = arith.constant 23 : index
    %143 = memref.load %arg2[%c23] : memref<72xf32, #tpu.memory_space<smem>>
    %144 = vector.broadcast %143 : f32 to vector<8x8xf32>
    %145 = arith.mulf %144, %15 : vector<8x8xf32>
    %146 = arith.addf %142, %145 : vector<8x8xf32>
    %c24 = arith.constant 24 : index
    %147 = memref.load %arg2[%c24] : memref<72xf32, #tpu.memory_space<smem>>
    %148 = vector.broadcast %147 : f32 to vector<8x8xf32>
    %149 = arith.mulf %148, %17 : vector<8x8xf32>
    %150 = arith.addf %146, %149 : vector<8x8xf32>
    %c25 = arith.constant 25 : index
    %151 = memref.load %arg2[%c25] : memref<72xf32, #tpu.memory_space<smem>>
    %152 = vector.broadcast %151 : f32 to vector<8x8xf32>
    %153 = arith.mulf %152, %19 : vector<8x8xf32>
    %154 = arith.addf %150, %153 : vector<8x8xf32>
    %c26 = arith.constant 26 : index
    %155 = memref.load %arg2[%c26] : memref<72xf32, #tpu.memory_space<smem>>
    %156 = vector.broadcast %155 : f32 to vector<8x8xf32>
    %157 = arith.mulf %156, %21 : vector<8x8xf32>
    %158 = arith.addf %154, %157 : vector<8x8xf32>
    %c2_55 = arith.constant 2 : index
    %159 = memref.load %arg3[%c2_55] : memref<8xf32, #tpu.memory_space<smem>>
    %160 = vector.broadcast %159 : f32 to vector<8x8xf32>
    %161 = arith.addf %158, %160 : vector<8x8xf32>
    %cst_56 = arith.constant 0.000000e+00 : f32
    %cst_57 = arith.constant 2.000000e+01 : f32
    %162 = vector.broadcast %cst_56 : f32 to vector<8x8xf32>
    %163 = arith.maximumf %162, %161 : vector<8x8xf32>
    %164 = vector.broadcast %cst_57 : f32 to vector<8x8xf32>
    %165 = arith.minimumf %164, %163 : vector<8x8xf32>
    %cst_58 = arith.constant 0.000000e+00 : f32
    %166 = vector.broadcast %cst_58 : f32 to vector<8x8xf32>
    %167 = arith.select %3, %165, %166 : vector<8x8xi1>, vector<8x8xf32>
    %168 = arith.truncf %167 : vector<8x8xf32> to vector<8x8xbf16>
    %c0_59 = arith.constant 0 : index
    %c2_60 = arith.constant 2 : index
    %c0_61 = arith.constant 0 : index
    %c0_62 = arith.constant 0 : index
    %169 = vector.load %arg4[%c0_59, %c2_60, %c0_61, %c0_62] : memref<2x8x8x8xbf16, #tpu.memory_space<vmem>>, vector<1x1x8x8xbf16>
    %170 = vector.shape_cast %169 : vector<1x1x8x8xbf16> to vector<8x8xbf16>
    %171 = vector.shape_cast %168 : vector<8x8xbf16> to vector<1x1x8x8xbf16>
    tpu.vector_store %arg4[%c0_59, %c2_60, %c0_61, %c0_62], %171 {strides = array<i32>} : memref<2x8x8x8xbf16, #tpu.memory_space<vmem>>, vector<1x1x8x8xbf16>,
    %cst_63 = arith.constant 0.000000e+00 : f32
    %172 = vector.broadcast %cst_63 : f32 to vector<8x8xf32>
    %c27 = arith.constant 27 : index
    %173 = memref.load %arg2[%c27] : memref<72xf32, #tpu.memory_space<smem>>
    %174 = vector.broadcast %173 : f32 to vector<8x8xf32>
    %175 = arith.mulf %174, %5 : vector<8x8xf32>
    %176 = arith.addf %172, %175 : vector<8x8xf32>
    %c28 = arith.constant 28 : index
    %177 = memref.load %arg2[%c28] : memref<72xf32, #tpu.memory_space<smem>>
    %178 = vector.broadcast %177 : f32 to vector<8x8xf32>
    %179 = arith.mulf %178, %7 : vector<8x8xf32>
    %180 = arith.addf %176, %179 : vector<8x8xf32>
    %c29 = arith.constant 29 : index
    %181 = memref.load %arg2[%c29] : memref<72xf32, #tpu.memory_space<smem>>
    %182 = vector.broadcast %181 : f32 to vector<8x8xf32>
    %183 = arith.mulf %182, %9 : vector<8x8xf32>
    %184 = arith.addf %180, %183 : vector<8x8xf32>
    %c30 = arith.constant 30 : index
    %185 = memref.load %arg2[%c30] : memref<72xf32, #tpu.memory_space<smem>>
    %186 = vector.broadcast %185 : f32 to vector<8x8xf32>
    %187 = arith.mulf %186, %11 : vector<8x8xf32>
    %188 = arith.addf %184, %187 : vector<8x8xf32>
    %c31 = arith.constant 31 : index
    %189 = memref.load %arg2[%c31] : memref<72xf32, #tpu.memory_space<smem>>
    %190 = vector.broadcast %189 : f32 to vector<8x8xf32>
    %191 = arith.mulf %190, %13 : vector<8x8xf32>
    %192 = arith.addf %188, %191 : vector<8x8xf32>
    %c32 = arith.constant 32 : index
    %193 = memref.load %arg2[%c32] : memref<72xf32, #tpu.memory_space<smem>>
    %194 = vector.broadcast %193 : f32 to vector<8x8xf32>
    %195 = arith.mulf %194, %15 : vector<8x8xf32>
    %196 = arith.addf %192, %195 : vector<8x8xf32>
    %c33 = arith.constant 33 : index
    %197 = memref.load %arg2[%c33] : memref<72xf32, #tpu.memory_space<smem>>
    %198 = vector.broadcast %197 : f32 to vector<8x8xf32>
    %199 = arith.mulf %198, %17 : vector<8x8xf32>
    %200 = arith.addf %196, %199 : vector<8x8xf32>
    %c34 = arith.constant 34 : index
    %201 = memref.load %arg2[%c34] : memref<72xf32, #tpu.memory_space<smem>>
    %202 = vector.broadcast %201 : f32 to vector<8x8xf32>
    %203 = arith.mulf %202, %19 : vector<8x8xf32>
    %204 = arith.addf %200, %203 : vector<8x8xf32>
    %c35 = arith.constant 35 : index
    %205 = memref.load %arg2[%c35] : memref<72xf32, #tpu.memory_space<smem>>
    %206 = vector.broadcast %205 : f32 to vector<8x8xf32>
    %207 = arith.mulf %206, %21 : vector<8x8xf32>
    %208 = arith.addf %204, %207 : vector<8x8xf32>
    %c3_64 = arith.constant 3 : index
    %209 = memref.load %arg3[%c3_64] : memref<8xf32, #tpu.memory_space<smem>>
    %210 = vector.broadcast %209 : f32 to vector<8x8xf32>
    %211 = arith.addf %208, %210 : vector<8x8xf32>
    %cst_65 = arith.constant 0.000000e+00 : f32
    %cst_66 = arith.constant 2.000000e+01 : f32
    %212 = vector.broadcast %cst_65 : f32 to vector<8x8xf32>
    %213 = arith.maximumf %212, %211 : vector<8x8xf32>
    %214 = vector.broadcast %cst_66 : f32 to vector<8x8xf32>
    %215 = arith.minimumf %214, %213 : vector<8x8xf32>
    %cst_67 = arith.constant 0.000000e+00 : f32
    %216 = vector.broadcast %cst_67 : f32 to vector<8x8xf32>
    %217 = arith.select %3, %215, %216 : vector<8x8xi1>, vector<8x8xf32>
    %218 = arith.truncf %217 : vector<8x8xf32> to vector<8x8xbf16>
    %c0_68 = arith.constant 0 : index
    %c3_69 = arith.constant 3 : index
    %c0_70 = arith.constant 0 : index
    %c0_71 = arith.constant 0 : index
    %219 = vector.load %arg4[%c0_68, %c3_69, %c0_70, %c0_71] : memref<2x8x8x8xbf16, #tpu.memory_space<vmem>>, vector<1x1x8x8xbf16>
    %220 = vector.shape_cast %219 : vector<1x1x8x8xbf16> to vector<8x8xbf16>
    %221 = vector.shape_cast %218 : vector<8x8xbf16> to vector<1x1x8x8xbf16>
    tpu.vector_store %arg4[%c0_68, %c3_69, %c0_70, %c0_71], %221 {strides = array<i32>} : memref<2x8x8x8xbf16, #tpu.memory_space<vmem>>, vector<1x1x8x8xbf16>,
    %cst_72 = arith.constant 0.000000e+00 : f32
    %222 = vector.broadcast %cst_72 : f32 to vector<8x8xf32>
    %c36 = arith.constant 36 : index
    %223 = memref.load %arg2[%c36] : memref<72xf32, #tpu.memory_space<smem>>
    %224 = vector.broadcast %223 : f32 to vector<8x8xf32>
    %225 = arith.mulf %224, %5 : vector<8x8xf32>
    %226 = arith.addf %222, %225 : vector<8x8xf32>
    %c37 = arith.constant 37 : index
    %227 = memref.load %arg2[%c37] : memref<72xf32, #tpu.memory_space<smem>>
    %228 = vector.broadcast %227 : f32 to vector<8x8xf32>
    %229 = arith.mulf %228, %7 : vector<8x8xf32>
    %230 = arith.addf %226, %229 : vector<8x8xf32>
    %c38 = arith.constant 38 : index
    %231 = memref.load %arg2[%c38] : memref<72xf32, #tpu.memory_space<smem>>
    %232 = vector.broadcast %231 : f32 to vector<8x8xf32>
    %233 = arith.mulf %232, %9 : vector<8x8xf32>
    %234 = arith.addf %230, %233 : vector<8x8xf32>
    %c39 = arith.constant 39 : index
    %235 = memref.load %arg2[%c39] : memref<72xf32, #tpu.memory_space<smem>>
    %236 = vector.broadcast %235 : f32 to vector<8x8xf32>
    %237 = arith.mulf %236, %11 : vector<8x8xf32>
    %238 = arith.addf %234, %237 : vector<8x8xf32>
    %c40 = arith.constant 40 : index
    %239 = memref.load %arg2[%c40] : memref<72xf32, #tpu.memory_space<smem>>
    %240 = vector.broadcast %239 : f32 to vector<8x8xf32>
    %241 = arith.mulf %240, %13 : vector<8x8xf32>
    %242 = arith.addf %238, %241 : vector<8x8xf32>
    %c41 = arith.constant 41 : index
    %243 = memref.load %arg2[%c41] : memref<72xf32, #tpu.memory_space<smem>>
    %244 = vector.broadcast %243 : f32 to vector<8x8xf32>
    %245 = arith.mulf %244, %15 : vector<8x8xf32>
    %246 = arith.addf %242, %245 : vector<8x8xf32>
    %c42 = arith.constant 42 : index
    %247 = memref.load %arg2[%c42] : memref<72xf32, #tpu.memory_space<smem>>
    %248 = vector.broadcast %247 : f32 to vector<8x8xf32>
    %249 = arith.mulf %248, %17 : vector<8x8xf32>
    %250 = arith.addf %246, %249 : vector<8x8xf32>
    %c43 = arith.constant 43 : index
    %251 = memref.load %arg2[%c43] : memref<72xf32, #tpu.memory_space<smem>>
    %252 = vector.broadcast %251 : f32 to vector<8x8xf32>
    %253 = arith.mulf %252, %19 : vector<8x8xf32>
    %254 = arith.addf %250, %253 : vector<8x8xf32>
    %c44 = arith.constant 44 : index
    %255 = memref.load %arg2[%c44] : memref<72xf32, #tpu.memory_space<smem>>
    %256 = vector.broadcast %255 : f32 to vector<8x8xf32>
    %257 = arith.mulf %256, %21 : vector<8x8xf32>
    %258 = arith.addf %254, %257 : vector<8x8xf32>
    %c4_73 = arith.constant 4 : index
    %259 = memref.load %arg3[%c4_73] : memref<8xf32, #tpu.memory_space<smem>>
    %260 = vector.broadcast %259 : f32 to vector<8x8xf32>
    %261 = arith.addf %258, %260 : vector<8x8xf32>
    %cst_74 = arith.constant 0.000000e+00 : f32
    %cst_75 = arith.constant 2.000000e+01 : f32
    %262 = vector.broadcast %cst_74 : f32 to vector<8x8xf32>
    %263 = arith.maximumf %262, %261 : vector<8x8xf32>
    %264 = vector.broadcast %cst_75 : f32 to vector<8x8xf32>
    %265 = arith.minimumf %264, %263 : vector<8x8xf32>
    %cst_76 = arith.constant 0.000000e+00 : f32
    %266 = vector.broadcast %cst_76 : f32 to vector<8x8xf32>
    %267 = arith.select %3, %265, %266 : vector<8x8xi1>, vector<8x8xf32>
    %268 = arith.truncf %267 : vector<8x8xf32> to vector<8x8xbf16>
    %c0_77 = arith.constant 0 : index
    %c4_78 = arith.constant 4 : index
    %c0_79 = arith.constant 0 : index
    %c0_80 = arith.constant 0 : index
    %269 = vector.load %arg4[%c0_77, %c4_78, %c0_79, %c0_80] : memref<2x8x8x8xbf16, #tpu.memory_space<vmem>>, vector<1x1x8x8xbf16>
    %270 = vector.shape_cast %269 : vector<1x1x8x8xbf16> to vector<8x8xbf16>
    %271 = vector.shape_cast %268 : vector<8x8xbf16> to vector<1x1x8x8xbf16>
    tpu.vector_store %arg4[%c0_77, %c4_78, %c0_79, %c0_80], %271 {strides = array<i32>} : memref<2x8x8x8xbf16, #tpu.memory_space<vmem>>, vector<1x1x8x8xbf16>,
    %cst_81 = arith.constant 0.000000e+00 : f32
    %272 = vector.broadcast %cst_81 : f32 to vector<8x8xf32>
    %c45 = arith.constant 45 : index
    %273 = memref.load %arg2[%c45] : memref<72xf32, #tpu.memory_space<smem>>
    %274 = vector.broadcast %273 : f32 to vector<8x8xf32>
    %275 = arith.mulf %274, %5 : vector<8x8xf32>
    %276 = arith.addf %272, %275 : vector<8x8xf32>
    %c46 = arith.constant 46 : index
    %277 = memref.load %arg2[%c46] : memref<72xf32, #tpu.memory_space<smem>>
    %278 = vector.broadcast %277 : f32 to vector<8x8xf32>
    %279 = arith.mulf %278, %7 : vector<8x8xf32>
    %280 = arith.addf %276, %279 : vector<8x8xf32>
    %c47 = arith.constant 47 : index
    %281 = memref.load %arg2[%c47] : memref<72xf32, #tpu.memory_space<smem>>
    %282 = vector.broadcast %281 : f32 to vector<8x8xf32>
    %283 = arith.mulf %282, %9 : vector<8x8xf32>
    %284 = arith.addf %280, %283 : vector<8x8xf32>
    %c48 = arith.constant 48 : index
    %285 = memref.load %arg2[%c48] : memref<72xf32, #tpu.memory_space<smem>>
    %286 = vector.broadcast %285 : f32 to vector<8x8xf32>
    %287 = arith.mulf %286, %11 : vector<8x8xf32>
    %288 = arith.addf %284, %287 : vector<8x8xf32>
    %c49 = arith.constant 49 : index
    %289 = memref.load %arg2[%c49] : memref<72xf32, #tpu.memory_space<smem>>
    %290 = vector.broadcast %289 : f32 to vector<8x8xf32>
    %291 = arith.mulf %290, %13 : vector<8x8xf32>
    %292 = arith.addf %288, %291 : vector<8x8xf32>
    %c50 = arith.constant 50 : index
    %293 = memref.load %arg2[%c50] : memref<72xf32, #tpu.memory_space<smem>>
    %294 = vector.broadcast %293 : f32 to vector<8x8xf32>
    %295 = arith.mulf %294, %15 : vector<8x8xf32>
    %296 = arith.addf %292, %295 : vector<8x8xf32>
    %c51 = arith.constant 51 : index
    %297 = memref.load %arg2[%c51] : memref<72xf32, #tpu.memory_space<smem>>
    %298 = vector.broadcast %297 : f32 to vector<8x8xf32>
    %299 = arith.mulf %298, %17 : vector<8x8xf32>
    %300 = arith.addf %296, %299 : vector<8x8xf32>
    %c52 = arith.constant 52 : index
    %301 = memref.load %arg2[%c52] : memref<72xf32, #tpu.memory_space<smem>>
    %302 = vector.broadcast %301 : f32 to vector<8x8xf32>
    %303 = arith.mulf %302, %19 : vector<8x8xf32>
    %304 = arith.addf %300, %303 : vector<8x8xf32>
    %c53 = arith.constant 53 : index
    %305 = memref.load %arg2[%c53] : memref<72xf32, #tpu.memory_space<smem>>
    %306 = vector.broadcast %305 : f32 to vector<8x8xf32>
    %307 = arith.mulf %306, %21 : vector<8x8xf32>
    %308 = arith.addf %304, %307 : vector<8x8xf32>
    %c5_82 = arith.constant 5 : index
    %309 = memref.load %arg3[%c5_82] : memref<8xf32, #tpu.memory_space<smem>>
    %310 = vector.broadcast %309 : f32 to vector<8x8xf32>
    %311 = arith.addf %308, %310 : vector<8x8xf32>
    %cst_83 = arith.constant 0.000000e+00 : f32
    %cst_84 = arith.constant 2.000000e+01 : f32
    %312 = vector.broadcast %cst_83 : f32 to vector<8x8xf32>
    %313 = arith.maximumf %312, %311 : vector<8x8xf32>
    %314 = vector.broadcast %cst_84 : f32 to vector<8x8xf32>
    %315 = arith.minimumf %314, %313 : vector<8x8xf32>
    %cst_85 = arith.constant 0.000000e+00 : f32
    %316 = vector.broadcast %cst_85 : f32 to vector<8x8xf32>
    %317 = arith.select %3, %315, %316 : vector<8x8xi1>, vector<8x8xf32>
    %318 = arith.truncf %317 : vector<8x8xf32> to vector<8x8xbf16>
    %c0_86 = arith.constant 0 : index
    %c5_87 = arith.constant 5 : index
    %c0_88 = arith.constant 0 : index
    %c0_89 = arith.constant 0 : index
    %319 = vector.load %arg4[%c0_86, %c5_87, %c0_88, %c0_89] : memref<2x8x8x8xbf16, #tpu.memory_space<vmem>>, vector<1x1x8x8xbf16>
    %320 = vector.shape_cast %319 : vector<1x1x8x8xbf16> to vector<8x8xbf16>
    %321 = vector.shape_cast %318 : vector<8x8xbf16> to vector<1x1x8x8xbf16>
    tpu.vector_store %arg4[%c0_86, %c5_87, %c0_88, %c0_89], %321 {strides = array<i32>} : memref<2x8x8x8xbf16, #tpu.memory_space<vmem>>, vector<1x1x8x8xbf16>,
    %cst_90 = arith.constant 0.000000e+00 : f32
    %322 = vector.broadcast %cst_90 : f32 to vector<8x8xf32>
    %c54 = arith.constant 54 : index
    %323 = memref.load %arg2[%c54] : memref<72xf32, #tpu.memory_space<smem>>
    %324 = vector.broadcast %323 : f32 to vector<8x8xf32>
    %325 = arith.mulf %324, %5 : vector<8x8xf32>
    %326 = arith.addf %322, %325 : vector<8x8xf32>
    %c55 = arith.constant 55 : index
    %327 = memref.load %arg2[%c55] : memref<72xf32, #tpu.memory_space<smem>>
    %328 = vector.broadcast %327 : f32 to vector<8x8xf32>
    %329 = arith.mulf %328, %7 : vector<8x8xf32>
    %330 = arith.addf %326, %329 : vector<8x8xf32>
    %c56 = arith.constant 56 : index
    %331 = memref.load %arg2[%c56] : memref<72xf32, #tpu.memory_space<smem>>
    %332 = vector.broadcast %331 : f32 to vector<8x8xf32>
    %333 = arith.mulf %332, %9 : vector<8x8xf32>
    %334 = arith.addf %330, %333 : vector<8x8xf32>
    %c57 = arith.constant 57 : index
    %335 = memref.load %arg2[%c57] : memref<72xf32, #tpu.memory_space<smem>>
    %336 = vector.broadcast %335 : f32 to vector<8x8xf32>
    %337 = arith.mulf %336, %11 : vector<8x8xf32>
    %338 = arith.addf %334, %337 : vector<8x8xf32>
    %c58 = arith.constant 58 : index
    %339 = memref.load %arg2[%c58] : memref<72xf32, #tpu.memory_space<smem>>
    %340 = vector.broadcast %339 : f32 to vector<8x8xf32>
    %341 = arith.mulf %340, %13 : vector<8x8xf32>
    %342 = arith.addf %338, %341 : vector<8x8xf32>
    %c59 = arith.constant 59 : index
    %343 = memref.load %arg2[%c59] : memref<72xf32, #tpu.memory_space<smem>>
    %344 = vector.broadcast %343 : f32 to vector<8x8xf32>
    %345 = arith.mulf %344, %15 : vector<8x8xf32>
    %346 = arith.addf %342, %345 : vector<8x8xf32>
    %c60 = arith.constant 60 : index
    %347 = memref.load %arg2[%c60] : memref<72xf32, #tpu.memory_space<smem>>
    %348 = vector.broadcast %347 : f32 to vector<8x8xf32>
    %349 = arith.mulf %348, %17 : vector<8x8xf32>
    %350 = arith.addf %346, %349 : vector<8x8xf32>
    %c61 = arith.constant 61 : index
    %351 = memref.load %arg2[%c61] : memref<72xf32, #tpu.memory_space<smem>>
    %352 = vector.broadcast %351 : f32 to vector<8x8xf32>
    %353 = arith.mulf %352, %19 : vector<8x8xf32>
    %354 = arith.addf %350, %353 : vector<8x8xf32>
    %c62 = arith.constant 62 : index
    %355 = memref.load %arg2[%c62] : memref<72xf32, #tpu.memory_space<smem>>
    %356 = vector.broadcast %355 : f32 to vector<8x8xf32>
    %357 = arith.mulf %356, %21 : vector<8x8xf32>
    %358 = arith.addf %354, %357 : vector<8x8xf32>
    %c6_91 = arith.constant 6 : index
    %359 = memref.load %arg3[%c6_91] : memref<8xf32, #tpu.memory_space<smem>>
    %360 = vector.broadcast %359 : f32 to vector<8x8xf32>
    %361 = arith.addf %358, %360 : vector<8x8xf32>
    %cst_92 = arith.constant 0.000000e+00 : f32
    %cst_93 = arith.constant 2.000000e+01 : f32
    %362 = vector.broadcast %cst_92 : f32 to vector<8x8xf32>
    %363 = arith.maximumf %362, %361 : vector<8x8xf32>
    %364 = vector.broadcast %cst_93 : f32 to vector<8x8xf32>
    %365 = arith.minimumf %364, %363 : vector<8x8xf32>
    %cst_94 = arith.constant 0.000000e+00 : f32
    %366 = vector.broadcast %cst_94 : f32 to vector<8x8xf32>
    %367 = arith.select %3, %365, %366 : vector<8x8xi1>, vector<8x8xf32>
    %368 = arith.truncf %367 : vector<8x8xf32> to vector<8x8xbf16>
    %c0_95 = arith.constant 0 : index
    %c6_96 = arith.constant 6 : index
    %c0_97 = arith.constant 0 : index
    %c0_98 = arith.constant 0 : index
    %369 = vector.load %arg4[%c0_95, %c6_96, %c0_97, %c0_98] : memref<2x8x8x8xbf16, #tpu.memory_space<vmem>>, vector<1x1x8x8xbf16>
    %370 = vector.shape_cast %369 : vector<1x1x8x8xbf16> to vector<8x8xbf16>
    %371 = vector.shape_cast %368 : vector<8x8xbf16> to vector<1x1x8x8xbf16>
    tpu.vector_store %arg4[%c0_95, %c6_96, %c0_97, %c0_98], %371 {strides = array<i32>} : memref<2x8x8x8xbf16, #tpu.memory_space<vmem>>, vector<1x1x8x8xbf16>,
    %cst_99 = arith.constant 0.000000e+00 : f32
    %372 = vector.broadcast %cst_99 : f32 to vector<8x8xf32>
    %c63 = arith.constant 63 : index
    %373 = memref.load %arg2[%c63] : memref<72xf32, #tpu.memory_space<smem>>
    %374 = vector.broadcast %373 : f32 to vector<8x8xf32>
    %375 = arith.mulf %374, %5 : vector<8x8xf32>
    %376 = arith.addf %372, %375 : vector<8x8xf32>
    %c64 = arith.constant 64 : index
    %377 = memref.load %arg2[%c64] : memref<72xf32, #tpu.memory_space<smem>>
    %378 = vector.broadcast %377 : f32 to vector<8x8xf32>
    %379 = arith.mulf %378, %7 : vector<8x8xf32>
    %380 = arith.addf %376, %379 : vector<8x8xf32>
    %c65 = arith.constant 65 : index
    %381 = memref.load %arg2[%c65] : memref<72xf32, #tpu.memory_space<smem>>
    %382 = vector.broadcast %381 : f32 to vector<8x8xf32>
    %383 = arith.mulf %382, %9 : vector<8x8xf32>
    %384 = arith.addf %380, %383 : vector<8x8xf32>
    %c66 = arith.constant 66 : index
    %385 = memref.load %arg2[%c66] : memref<72xf32, #tpu.memory_space<smem>>
    %386 = vector.broadcast %385 : f32 to vector<8x8xf32>
    %387 = arith.mulf %386, %11 : vector<8x8xf32>
    %388 = arith.addf %384, %387 : vector<8x8xf32>
    %c67 = arith.constant 67 : index
    %389 = memref.load %arg2[%c67] : memref<72xf32, #tpu.memory_space<smem>>
    %390 = vector.broadcast %389 : f32 to vector<8x8xf32>
    %391 = arith.mulf %390, %13 : vector<8x8xf32>
    %392 = arith.addf %388, %391 : vector<8x8xf32>
    %c68 = arith.constant 68 : index
    %393 = memref.load %arg2[%c68] : memref<72xf32, #tpu.memory_space<smem>>
    %394 = vector.broadcast %393 : f32 to vector<8x8xf32>
    %395 = arith.mulf %394, %15 : vector<8x8xf32>
    %396 = arith.addf %392, %395 : vector<8x8xf32>
    %c69 = arith.constant 69 : index
    %397 = memref.load %arg2[%c69] : memref<72xf32, #tpu.memory_space<smem>>
    %398 = vector.broadcast %397 : f32 to vector<8x8xf32>
    %399 = arith.mulf %398, %17 : vector<8x8xf32>
    %400 = arith.addf %396, %399 : vector<8x8xf32>
    %c70 = arith.constant 70 : index
    %401 = memref.load %arg2[%c70] : memref<72xf32, #tpu.memory_space<smem>>
    %402 = vector.broadcast %401 : f32 to vector<8x8xf32>
    %403 = arith.mulf %402, %19 : vector<8x8xf32>
    %404 = arith.addf %400, %403 : vector<8x8xf32>
    %c71 = arith.constant 71 : index
    %405 = memref.load %arg2[%c71] : memref<72xf32, #tpu.memory_space<smem>>
    %406 = vector.broadcast %405 : f32 to vector<8x8xf32>
    %407 = arith.mulf %406, %21 : vector<8x8xf32>
    %408 = arith.addf %404, %407 : vector<8x8xf32>
    %c7_100 = arith.constant 7 : index
    %409 = memref.load %arg3[%c7_100] : memref<8xf32, #tpu.memory_space<smem>>
    %410 = vector.broadcast %409 : f32 to vector<8x8xf32>
    %411 = arith.addf %408, %410 : vector<8x8xf32>
    %cst_101 = arith.constant 0.000000e+00 : f32
    %cst_102 = arith.constant 2.000000e+01 : f32
    %412 = vector.broadcast %cst_101 : f32 to vector<8x8xf32>
    %413 = arith.maximumf %412, %411 : vector<8x8xf32>
    %414 = vector.broadcast %cst_102 : f32 to vector<8x8xf32>
    %415 = arith.minimumf %414, %413 : vector<8x8xf32>
    %cst_103 = arith.constant 0.000000e+00 : f32
    %416 = vector.broadcast %cst_103 : f32 to vector<8x8xf32>
    %417 = arith.select %3, %415, %416 : vector<8x8xi1>, vector<8x8xf32>
    %418 = arith.truncf %417 : vector<8x8xf32> to vector<8x8xbf16>
    %c0_104 = arith.constant 0 : index
    %c7_105 = arith.constant 7 : index
    %c0_106 = arith.constant 0 : index
    %c0_107 = arith.constant 0 : index
    %419 = vector.load %arg4[%c0_104, %c7_105, %c0_106, %c0_107] : memref<2x8x8x8xbf16, #tpu.memory_space<vmem>>, vector<1x1x8x8xbf16>
    %420 = vector.shape_cast %419 : vector<1x1x8x8xbf16> to vector<8x8xbf16>
    %421 = vector.shape_cast %418 : vector<8x8xbf16> to vector<1x1x8x8xbf16>
    tpu.vector_store %arg4[%c0_104, %c7_105, %c0_106, %c0_107], %421 {strides = array<i32>} : memref<2x8x8x8xbf16, #tpu.memory_space<vmem>>, vector<1x1x8x8xbf16>,
    %c1_108 = arith.constant 1 : index
    %422 = memref.load %arg0[%c1_108] : memref<2xi32, #tpu.memory_space<smem>>
    %423 = vector.broadcast %422 : i32 to vector<8x8xi32>
    %424 = arith.cmpi slt, %0, %423 : vector<8x8xi32>
    %c1_109 = arith.constant 1 : index
    %c0_110 = arith.constant 0 : index
    %c0_111 = arith.constant 0 : index
    %c0_112 = arith.constant 0 : index
    %425 = vector.load %arg1[%c1_109, %c0_110, %c0_111, %c0_112] : memref<2x4x9x9xf32, #tpu.memory_space<vmem>>, vector<1x1x8x8xf32>
    %426 = vector.shape_cast %425 : vector<1x1x8x8xf32> to vector<8x8xf32>
    %c1_113 = arith.constant 1 : index
    %c1_114 = arith.constant 1 : index
    %c0_115 = arith.constant 0 : index
    %c0_116 = arith.constant 0 : index
    %427 = vector.load %arg1[%c1_113, %c1_114, %c0_115, %c0_116] : memref<2x4x9x9xf32, #tpu.memory_space<vmem>>, vector<1x1x8x8xf32>
    %428 = vector.shape_cast %427 : vector<1x1x8x8xf32> to vector<8x8xf32>
    %c1_117 = arith.constant 1 : index
    %c0_118 = arith.constant 0 : index
    %c0_119 = arith.constant 0 : index
    %c1_120 = arith.constant 1 : index
    %429 = vector.load %arg1[%c1_117, %c0_118, %c0_119, %c1_120] : memref<2x4x9x9xf32, #tpu.memory_space<vmem>>, vector<1x1x8x8xf32>
    %430 = vector.shape_cast %429 : vector<1x1x8x8xf32> to vector<8x8xf32>
    %c1_121 = arith.constant 1 : index
    %c2_122 = arith.constant 2 : index
    %c0_123 = arith.constant 0 : index
    %c0_124 = arith.constant 0 : index
    %431 = vector.load %arg1[%c1_121, %c2_122, %c0_123, %c0_124] : memref<2x4x9x9xf32, #tpu.memory_space<vmem>>, vector<1x1x8x8xf32>
    %432 = vector.shape_cast %431 : vector<1x1x8x8xf32> to vector<8x8xf32>
    %c1_125 = arith.constant 1 : index
    %c3_126 = arith.constant 3 : index
    %c0_127 = arith.constant 0 : index
    %c0_128 = arith.constant 0 : index
    %433 = vector.load %arg1[%c1_125, %c3_126, %c0_127, %c0_128] : memref<2x4x9x9xf32, #tpu.memory_space<vmem>>, vector<1x1x8x8xf32>
    %434 = vector.shape_cast %433 : vector<1x1x8x8xf32> to vector<8x8xf32>
    %c1_129 = arith.constant 1 : index
    %c2_130 = arith.constant 2 : index
    %c0_131 = arith.constant 0 : index
    %c1_132 = arith.constant 1 : index
    %435 = vector.load %arg1[%c1_129, %c2_130, %c0_131, %c1_132] : memref<2x4x9x9xf32, #tpu.memory_space<vmem>>, vector<1x1x8x8xf32>
    %436 = vector.shape_cast %435 : vector<1x1x8x8xf32> to vector<8x8xf32>
    %c1_133 = arith.constant 1 : index
    %c0_134 = arith.constant 0 : index
    %c1_135 = arith.constant 1 : index
    %c0_136 = arith.constant 0 : index
    %437 = vector.load %arg1[%c1_133, %c0_134, %c1_135, %c0_136] : memref<2x4x9x9xf32, #tpu.memory_space<vmem>>, vector<1x1x8x8xf32>
    %438 = vector.shape_cast %437 : vector<1x1x8x8xf32> to vector<8x8xf32>
    %c1_137 = arith.constant 1 : index
    %c1_138 = arith.constant 1 : index
    %c1_139 = arith.constant 1 : index
    %c0_140 = arith.constant 0 : index
    %439 = vector.load %arg1[%c1_137, %c1_138, %c1_139, %c0_140] : memref<2x4x9x9xf32, #tpu.memory_space<vmem>>, vector<1x1x8x8xf32>
    %440 = vector.shape_cast %439 : vector<1x1x8x8xf32> to vector<8x8xf32>
    %c1_141 = arith.constant 1 : index
    %c0_142 = arith.constant 0 : index
    %c1_143 = arith.constant 1 : index
    %c1_144 = arith.constant 1 : index
    %441 = vector.load %arg1[%c1_141, %c0_142, %c1_143, %c1_144] : memref<2x4x9x9xf32, #tpu.memory_space<vmem>>, vector<1x1x8x8xf32>
    %442 = vector.shape_cast %441 : vector<1x1x8x8xf32> to vector<8x8xf32>
    %cst_145 = arith.constant 0.000000e+00 : f32
    %443 = vector.broadcast %cst_145 : f32 to vector<8x8xf32>
    %c0_146 = arith.constant 0 : index
    %444 = memref.load %arg2[%c0_146] : memref<72xf32, #tpu.memory_space<smem>>
    %445 = vector.broadcast %444 : f32 to vector<8x8xf32>
    %446 = arith.mulf %445, %426 : vector<8x8xf32>
    %447 = arith.addf %443, %446 : vector<8x8xf32>
    %c1_147 = arith.constant 1 : index
    %448 = memref.load %arg2[%c1_147] : memref<72xf32, #tpu.memory_space<smem>>
    %449 = vector.broadcast %448 : f32 to vector<8x8xf32>
    %450 = arith.mulf %449, %428 : vector<8x8xf32>
    %451 = arith.addf %447, %450 : vector<8x8xf32>
    %c2_148 = arith.constant 2 : index
    %452 = memref.load %arg2[%c2_148] : memref<72xf32, #tpu.memory_space<smem>>
    %453 = vector.broadcast %452 : f32 to vector<8x8xf32>
    %454 = arith.mulf %453, %430 : vector<8x8xf32>
    %455 = arith.addf %451, %454 : vector<8x8xf32>
    %c3_149 = arith.constant 3 : index
    %456 = memref.load %arg2[%c3_149] : memref<72xf32, #tpu.memory_space<smem>>
    %457 = vector.broadcast %456 : f32 to vector<8x8xf32>
    %458 = arith.mulf %457, %432 : vector<8x8xf32>
    %459 = arith.addf %455, %458 : vector<8x8xf32>
    %c4_150 = arith.constant 4 : index
    %460 = memref.load %arg2[%c4_150] : memref<72xf32, #tpu.memory_space<smem>>
    %461 = vector.broadcast %460 : f32 to vector<8x8xf32>
    %462 = arith.mulf %461, %434 : vector<8x8xf32>
    %463 = arith.addf %459, %462 : vector<8x8xf32>
    %c5_151 = arith.constant 5 : index
    %464 = memref.load %arg2[%c5_151] : memref<72xf32, #tpu.memory_space<smem>>
    %465 = vector.broadcast %464 : f32 to vector<8x8xf32>
    %466 = arith.mulf %465, %436 : vector<8x8xf32>
    %467 = arith.addf %463, %466 : vector<8x8xf32>
    %c6_152 = arith.constant 6 : index
    %468 = memref.load %arg2[%c6_152] : memref<72xf32, #tpu.memory_space<smem>>
    %469 = vector.broadcast %468 : f32 to vector<8x8xf32>
    %470 = arith.mulf %469, %438 : vector<8x8xf32>
    %471 = arith.addf %467, %470 : vector<8x8xf32>
    %c7_153 = arith.constant 7 : index
    %472 = memref.load %arg2[%c7_153] : memref<72xf32, #tpu.memory_space<smem>>
    %473 = vector.broadcast %472 : f32 to vector<8x8xf32>
    %474 = arith.mulf %473, %440 : vector<8x8xf32>
    %475 = arith.addf %471, %474 : vector<8x8xf32>
    %c8_154 = arith.constant 8 : index
    %476 = memref.load %arg2[%c8_154] : memref<72xf32, #tpu.memory_space<smem>>
    %477 = vector.broadcast %476 : f32 to vector<8x8xf32>
    %478 = arith.mulf %477, %442 : vector<8x8xf32>
    %479 = arith.addf %475, %478 : vector<8x8xf32>
    %c0_155 = arith.constant 0 : index
    %480 = memref.load %arg3[%c0_155] : memref<8xf32, #tpu.memory_space<smem>>
    %481 = vector.broadcast %480 : f32 to vector<8x8xf32>
    %482 = arith.addf %479, %481 : vector<8x8xf32>
    %cst_156 = arith.constant 0.000000e+00 : f32
    %cst_157 = arith.constant 2.000000e+01 : f32
    %483 = vector.broadcast %cst_156 : f32 to vector<8x8xf32>
    %484 = arith.maximumf %483, %482 : vector<8x8xf32>
    %485 = vector.broadcast %cst_157 : f32 to vector<8x8xf32>
    %486 = arith.minimumf %485, %484 : vector<8x8xf32>
    %cst_158 = arith.constant 0.000000e+00 : f32
    %487 = vector.broadcast %cst_158 : f32 to vector<8x8xf32>
    %488 = arith.select %424, %486, %487 : vector<8x8xi1>, vector<8x8xf32>
    %489 = arith.truncf %488 : vector<8x8xf32> to vector<8x8xbf16>
    %c1_159 = arith.constant 1 : index
    %c0_160 = arith.constant 0 : index
    %c0_161 = arith.constant 0 : index
    %c0_162 = arith.constant 0 : index
    %490 = vector.load %arg4[%c1_159, %c0_160, %c0_161, %c0_162] : memref<2x8x8x8xbf16, #tpu.memory_space<vmem>>, vector<1x1x8x8xbf16>
    %491 = vector.shape_cast %490 : vector<1x1x8x8xbf16> to vector<8x8xbf16>
    %492 = vector.shape_cast %489 : vector<8x8xbf16> to vector<1x1x8x8xbf16>
    tpu.vector_store %arg4[%c1_159, %c0_160, %c0_161, %c0_162], %492 {strides = array<i32>} : memref<2x8x8x8xbf16, #tpu.memory_space<vmem>>, vector<1x1x8x8xbf16>,
    %cst_163 = arith.constant 0.000000e+00 : f32
    %493 = vector.broadcast %cst_163 : f32 to vector<8x8xf32>
    %c9_164 = arith.constant 9 : index
    %494 = memref.load %arg2[%c9_164] : memref<72xf32, #tpu.memory_space<smem>>
    %495 = vector.broadcast %494 : f32 to vector<8x8xf32>
    %496 = arith.mulf %495, %426 : vector<8x8xf32>
    %497 = arith.addf %493, %496 : vector<8x8xf32>
    %c10_165 = arith.constant 10 : index
    %498 = memref.load %arg2[%c10_165] : memref<72xf32, #tpu.memory_space<smem>>
    %499 = vector.broadcast %498 : f32 to vector<8x8xf32>
    %500 = arith.mulf %499, %428 : vector<8x8xf32>
    %501 = arith.addf %497, %500 : vector<8x8xf32>
    %c11_166 = arith.constant 11 : index
    %502 = memref.load %arg2[%c11_166] : memref<72xf32, #tpu.memory_space<smem>>
    %503 = vector.broadcast %502 : f32 to vector<8x8xf32>
    %504 = arith.mulf %503, %430 : vector<8x8xf32>
    %505 = arith.addf %501, %504 : vector<8x8xf32>
    %c12_167 = arith.constant 12 : index
    %506 = memref.load %arg2[%c12_167] : memref<72xf32, #tpu.memory_space<smem>>
    %507 = vector.broadcast %506 : f32 to vector<8x8xf32>
    %508 = arith.mulf %507, %432 : vector<8x8xf32>
    %509 = arith.addf %505, %508 : vector<8x8xf32>
    %c13_168 = arith.constant 13 : index
    %510 = memref.load %arg2[%c13_168] : memref<72xf32, #tpu.memory_space<smem>>
    %511 = vector.broadcast %510 : f32 to vector<8x8xf32>
    %512 = arith.mulf %511, %434 : vector<8x8xf32>
    %513 = arith.addf %509, %512 : vector<8x8xf32>
    %c14_169 = arith.constant 14 : index
    %514 = memref.load %arg2[%c14_169] : memref<72xf32, #tpu.memory_space<smem>>
    %515 = vector.broadcast %514 : f32 to vector<8x8xf32>
    %516 = arith.mulf %515, %436 : vector<8x8xf32>
    %517 = arith.addf %513, %516 : vector<8x8xf32>
    %c15_170 = arith.constant 15 : index
    %518 = memref.load %arg2[%c15_170] : memref<72xf32, #tpu.memory_space<smem>>
    %519 = vector.broadcast %518 : f32 to vector<8x8xf32>
    %520 = arith.mulf %519, %438 : vector<8x8xf32>
    %521 = arith.addf %517, %520 : vector<8x8xf32>
    %c16_171 = arith.constant 16 : index
    %522 = memref.load %arg2[%c16_171] : memref<72xf32, #tpu.memory_space<smem>>
    %523 = vector.broadcast %522 : f32 to vector<8x8xf32>
    %524 = arith.mulf %523, %440 : vector<8x8xf32>
    %525 = arith.addf %521, %524 : vector<8x8xf32>
    %c17_172 = arith.constant 17 : index
    %526 = memref.load %arg2[%c17_172] : memref<72xf32, #tpu.memory_space<smem>>
    %527 = vector.broadcast %526 : f32 to vector<8x8xf32>
    %528 = arith.mulf %527, %442 : vector<8x8xf32>
    %529 = arith.addf %525, %528 : vector<8x8xf32>
    %c1_173 = arith.constant 1 : index
    %530 = memref.load %arg3[%c1_173] : memref<8xf32, #tpu.memory_space<smem>>
    %531 = vector.broadcast %530 : f32 to vector<8x8xf32>
    %532 = arith.addf %529, %531 : vector<8x8xf32>
    %cst_174 = arith.constant 0.000000e+00 : f32
    %cst_175 = arith.constant 2.000000e+01 : f32
    %533 = vector.broadcast %cst_174 : f32 to vector<8x8xf32>
    %534 = arith.maximumf %533, %532 : vector<8x8xf32>
    %535 = vector.broadcast %cst_175 : f32 to vector<8x8xf32>
    %536 = arith.minimumf %535, %534 : vector<8x8xf32>
    %cst_176 = arith.constant 0.000000e+00 : f32
    %537 = vector.broadcast %cst_176 : f32 to vector<8x8xf32>
    %538 = arith.select %424, %536, %537 : vector<8x8xi1>, vector<8x8xf32>
    %539 = arith.truncf %538 : vector<8x8xf32> to vector<8x8xbf16>
    %c1_177 = arith.constant 1 : index
    %c1_178 = arith.constant 1 : index
    %c0_179 = arith.constant 0 : index
    %c0_180 = arith.constant 0 : index
    %540 = vector.load %arg4[%c1_177, %c1_178, %c0_179, %c0_180] : memref<2x8x8x8xbf16, #tpu.memory_space<vmem>>, vector<1x1x8x8xbf16>
    %541 = vector.shape_cast %540 : vector<1x1x8x8xbf16> to vector<8x8xbf16>
    %542 = vector.shape_cast %539 : vector<8x8xbf16> to vector<1x1x8x8xbf16>
    tpu.vector_store %arg4[%c1_177, %c1_178, %c0_179, %c0_180], %542 {strides = array<i32>} : memref<2x8x8x8xbf16, #tpu.memory_space<vmem>>, vector<1x1x8x8xbf16>,
    %cst_181 = arith.constant 0.000000e+00 : f32
    %543 = vector.broadcast %cst_181 : f32 to vector<8x8xf32>
    %c18_182 = arith.constant 18 : index
    %544 = memref.load %arg2[%c18_182] : memref<72xf32, #tpu.memory_space<smem>>
    %545 = vector.broadcast %544 : f32 to vector<8x8xf32>
    %546 = arith.mulf %545, %426 : vector<8x8xf32>
    %547 = arith.addf %543, %546 : vector<8x8xf32>
    %c19_183 = arith.constant 19 : index
    %548 = memref.load %arg2[%c19_183] : memref<72xf32, #tpu.memory_space<smem>>
    %549 = vector.broadcast %548 : f32 to vector<8x8xf32>
    %550 = arith.mulf %549, %428 : vector<8x8xf32>
    %551 = arith.addf %547, %550 : vector<8x8xf32>
    %c20_184 = arith.constant 20 : index
    %552 = memref.load %arg2[%c20_184] : memref<72xf32, #tpu.memory_space<smem>>
    %553 = vector.broadcast %552 : f32 to vector<8x8xf32>
    %554 = arith.mulf %553, %430 : vector<8x8xf32>
    %555 = arith.addf %551, %554 : vector<8x8xf32>
    %c21_185 = arith.constant 21 : index
    %556 = memref.load %arg2[%c21_185] : memref<72xf32, #tpu.memory_space<smem>>
    %557 = vector.broadcast %556 : f32 to vector<8x8xf32>
    %558 = arith.mulf %557, %432 : vector<8x8xf32>
    %559 = arith.addf %555, %558 : vector<8x8xf32>
    %c22_186 = arith.constant 22 : index
    %560 = memref.load %arg2[%c22_186] : memref<72xf32, #tpu.memory_space<smem>>
    %561 = vector.broadcast %560 : f32 to vector<8x8xf32>
    %562 = arith.mulf %561, %434 : vector<8x8xf32>
    %563 = arith.addf %559, %562 : vector<8x8xf32>
    %c23_187 = arith.constant 23 : index
    %564 = memref.load %arg2[%c23_187] : memref<72xf32, #tpu.memory_space<smem>>
    %565 = vector.broadcast %564 : f32 to vector<8x8xf32>
    %566 = arith.mulf %565, %436 : vector<8x8xf32>
    %567 = arith.addf %563, %566 : vector<8x8xf32>
    %c24_188 = arith.constant 24 : index
    %568 = memref.load %arg2[%c24_188] : memref<72xf32, #tpu.memory_space<smem>>
    %569 = vector.broadcast %568 : f32 to vector<8x8xf32>
    %570 = arith.mulf %569, %438 : vector<8x8xf32>
    %571 = arith.addf %567, %570 : vector<8x8xf32>
    %c25_189 = arith.constant 25 : index
    %572 = memref.load %arg2[%c25_189] : memref<72xf32, #tpu.memory_space<smem>>
    %573 = vector.broadcast %572 : f32 to vector<8x8xf32>
    %574 = arith.mulf %573, %440 : vector<8x8xf32>
    %575 = arith.addf %571, %574 : vector<8x8xf32>
    %c26_190 = arith.constant 26 : index
    %576 = memref.load %arg2[%c26_190] : memref<72xf32, #tpu.memory_space<smem>>
    %577 = vector.broadcast %576 : f32 to vector<8x8xf32>
    %578 = arith.mulf %577, %442 : vector<8x8xf32>
    %579 = arith.addf %575, %578 : vector<8x8xf32>
    %c2_191 = arith.constant 2 : index
    %580 = memref.load %arg3[%c2_191] : memref<8xf32, #tpu.memory_space<smem>>
    %581 = vector.broadcast %580 : f32 to vector<8x8xf32>
    %582 = arith.addf %579, %581 : vector<8x8xf32>
    %cst_192 = arith.constant 0.000000e+00 : f32
    %cst_193 = arith.constant 2.000000e+01 : f32
    %583 = vector.broadcast %cst_192 : f32 to vector<8x8xf32>
    %584 = arith.maximumf %583, %582 : vector<8x8xf32>
    %585 = vector.broadcast %cst_193 : f32 to vector<8x8xf32>
    %586 = arith.minimumf %585, %584 : vector<8x8xf32>
    %cst_194 = arith.constant 0.000000e+00 : f32
    %587 = vector.broadcast %cst_194 : f32 to vector<8x8xf32>
    %588 = arith.select %424, %586, %587 : vector<8x8xi1>, vector<8x8xf32>
    %589 = arith.truncf %588 : vector<8x8xf32> to vector<8x8xbf16>
    %c1_195 = arith.constant 1 : index
    %c2_196 = arith.constant 2 : index
    %c0_197 = arith.constant 0 : index
    %c0_198 = arith.constant 0 : index
    %590 = vector.load %arg4[%c1_195, %c2_196, %c0_197, %c0_198] : memref<2x8x8x8xbf16, #tpu.memory_space<vmem>>, vector<1x1x8x8xbf16>
    %591 = vector.shape_cast %590 : vector<1x1x8x8xbf16> to vector<8x8xbf16>
    %592 = vector.shape_cast %589 : vector<8x8xbf16> to vector<1x1x8x8xbf16>
    tpu.vector_store %arg4[%c1_195, %c2_196, %c0_197, %c0_198], %592 {strides = array<i32>} : memref<2x8x8x8xbf16, #tpu.memory_space<vmem>>, vector<1x1x8x8xbf16>,
    %cst_199 = arith.constant 0.000000e+00 : f32
    %593 = vector.broadcast %cst_199 : f32 to vector<8x8xf32>
    %c27_200 = arith.constant 27 : index
    %594 = memref.load %arg2[%c27_200] : memref<72xf32, #tpu.memory_space<smem>>
    %595 = vector.broadcast %594 : f32 to vector<8x8xf32>
    %596 = arith.mulf %595, %426 : vector<8x8xf32>
    %597 = arith.addf %593, %596 : vector<8x8xf32>
    %c28_201 = arith.constant 28 : index
    %598 = memref.load %arg2[%c28_201] : memref<72xf32, #tpu.memory_space<smem>>
    %599 = vector.broadcast %598 : f32 to vector<8x8xf32>
    %600 = arith.mulf %599, %428 : vector<8x8xf32>
    %601 = arith.addf %597, %600 : vector<8x8xf32>
    %c29_202 = arith.constant 29 : index
    %602 = memref.load %arg2[%c29_202] : memref<72xf32, #tpu.memory_space<smem>>
    %603 = vector.broadcast %602 : f32 to vector<8x8xf32>
    %604 = arith.mulf %603, %430 : vector<8x8xf32>
    %605 = arith.addf %601, %604 : vector<8x8xf32>
    %c30_203 = arith.constant 30 : index
    %606 = memref.load %arg2[%c30_203] : memref<72xf32, #tpu.memory_space<smem>>
    %607 = vector.broadcast %606 : f32 to vector<8x8xf32>
    %608 = arith.mulf %607, %432 : vector<8x8xf32>
    %609 = arith.addf %605, %608 : vector<8x8xf32>
    %c31_204 = arith.constant 31 : index
    %610 = memref.load %arg2[%c31_204] : memref<72xf32, #tpu.memory_space<smem>>
    %611 = vector.broadcast %610 : f32 to vector<8x8xf32>
    %612 = arith.mulf %611, %434 : vector<8x8xf32>
    %613 = arith.addf %609, %612 : vector<8x8xf32>
    %c32_205 = arith.constant 32 : index
    %614 = memref.load %arg2[%c32_205] : memref<72xf32, #tpu.memory_space<smem>>
    %615 = vector.broadcast %614 : f32 to vector<8x8xf32>
    %616 = arith.mulf %615, %436 : vector<8x8xf32>
    %617 = arith.addf %613, %616 : vector<8x8xf32>
    %c33_206 = arith.constant 33 : index
    %618 = memref.load %arg2[%c33_206] : memref<72xf32, #tpu.memory_space<smem>>
    %619 = vector.broadcast %618 : f32 to vector<8x8xf32>
    %620 = arith.mulf %619, %438 : vector<8x8xf32>
    %621 = arith.addf %617, %620 : vector<8x8xf32>
    %c34_207 = arith.constant 34 : index
    %622 = memref.load %arg2[%c34_207] : memref<72xf32, #tpu.memory_space<smem>>
    %623 = vector.broadcast %622 : f32 to vector<8x8xf32>
    %624 = arith.mulf %623, %440 : vector<8x8xf32>
    %625 = arith.addf %621, %624 : vector<8x8xf32>
    %c35_208 = arith.constant 35 : index
    %626 = memref.load %arg2[%c35_208] : memref<72xf32, #tpu.memory_space<smem>>
    %627 = vector.broadcast %626 : f32 to vector<8x8xf32>
    %628 = arith.mulf %627, %442 : vector<8x8xf32>
    %629 = arith.addf %625, %628 : vector<8x8xf32>
    %c3_209 = arith.constant 3 : index
    %630 = memref.load %arg3[%c3_209] : memref<8xf32, #tpu.memory_space<smem>>
    %631 = vector.broadcast %630 : f32 to vector<8x8xf32>
    %632 = arith.addf %629, %631 : vector<8x8xf32>
    %cst_210 = arith.constant 0.000000e+00 : f32
    %cst_211 = arith.constant 2.000000e+01 : f32
    %633 = vector.broadcast %cst_210 : f32 to vector<8x8xf32>
    %634 = arith.maximumf %633, %632 : vector<8x8xf32>
    %635 = vector.broadcast %cst_211 : f32 to vector<8x8xf32>
    %636 = arith.minimumf %635, %634 : vector<8x8xf32>
    %cst_212 = arith.constant 0.000000e+00 : f32
    %637 = vector.broadcast %cst_212 : f32 to vector<8x8xf32>
    %638 = arith.select %424, %636, %637 : vector<8x8xi1>, vector<8x8xf32>
    %639 = arith.truncf %638 : vector<8x8xf32> to vector<8x8xbf16>
    %c1_213 = arith.constant 1 : index
    %c3_214 = arith.constant 3 : index
    %c0_215 = arith.constant 0 : index
    %c0_216 = arith.constant 0 : index
    %640 = vector.load %arg4[%c1_213, %c3_214, %c0_215, %c0_216] : memref<2x8x8x8xbf16, #tpu.memory_space<vmem>>, vector<1x1x8x8xbf16>
    %641 = vector.shape_cast %640 : vector<1x1x8x8xbf16> to vector<8x8xbf16>
    %642 = vector.shape_cast %639 : vector<8x8xbf16> to vector<1x1x8x8xbf16>
    tpu.vector_store %arg4[%c1_213, %c3_214, %c0_215, %c0_216], %642 {strides = array<i32>} : memref<2x8x8x8xbf16, #tpu.memory_space<vmem>>, vector<1x1x8x8xbf16>,
    %cst_217 = arith.constant 0.000000e+00 : f32
    %643 = vector.broadcast %cst_217 : f32 to vector<8x8xf32>
    %c36_218 = arith.constant 36 : index
    %644 = memref.load %arg2[%c36_218] : memref<72xf32, #tpu.memory_space<smem>>
    %645 = vector.broadcast %644 : f32 to vector<8x8xf32>
    %646 = arith.mulf %645, %426 : vector<8x8xf32>
    %647 = arith.addf %643, %646 : vector<8x8xf32>
    %c37_219 = arith.constant 37 : index
    %648 = memref.load %arg2[%c37_219] : memref<72xf32, #tpu.memory_space<smem>>
    %649 = vector.broadcast %648 : f32 to vector<8x8xf32>
    %650 = arith.mulf %649, %428 : vector<8x8xf32>
    %651 = arith.addf %647, %650 : vector<8x8xf32>
    %c38_220 = arith.constant 38 : index
    %652 = memref.load %arg2[%c38_220] : memref<72xf32, #tpu.memory_space<smem>>
    %653 = vector.broadcast %652 : f32 to vector<8x8xf32>
    %654 = arith.mulf %653, %430 : vector<8x8xf32>
    %655 = arith.addf %651, %654 : vector<8x8xf32>
    %c39_221 = arith.constant 39 : index
    %656 = memref.load %arg2[%c39_221] : memref<72xf32, #tpu.memory_space<smem>>
    %657 = vector.broadcast %656 : f32 to vector<8x8xf32>
    %658 = arith.mulf %657, %432 : vector<8x8xf32>
    %659 = arith.addf %655, %658 : vector<8x8xf32>
    %c40_222 = arith.constant 40 : index
    %660 = memref.load %arg2[%c40_222] : memref<72xf32, #tpu.memory_space<smem>>
    %661 = vector.broadcast %660 : f32 to vector<8x8xf32>
    %662 = arith.mulf %661, %434 : vector<8x8xf32>
    %663 = arith.addf %659, %662 : vector<8x8xf32>
    %c41_223 = arith.constant 41 : index
    %664 = memref.load %arg2[%c41_223] : memref<72xf32, #tpu.memory_space<smem>>
    %665 = vector.broadcast %664 : f32 to vector<8x8xf32>
    %666 = arith.mulf %665, %436 : vector<8x8xf32>
    %667 = arith.addf %663, %666 : vector<8x8xf32>
    %c42_224 = arith.constant 42 : index
    %668 = memref.load %arg2[%c42_224] : memref<72xf32, #tpu.memory_space<smem>>
    %669 = vector.broadcast %668 : f32 to vector<8x8xf32>
    %670 = arith.mulf %669, %438 : vector<8x8xf32>
    %671 = arith.addf %667, %670 : vector<8x8xf32>
    %c43_225 = arith.constant 43 : index
    %672 = memref.load %arg2[%c43_225] : memref<72xf32, #tpu.memory_space<smem>>
    %673 = vector.broadcast %672 : f32 to vector<8x8xf32>
    %674 = arith.mulf %673, %440 : vector<8x8xf32>
    %675 = arith.addf %671, %674 : vector<8x8xf32>
    %c44_226 = arith.constant 44 : index
    %676 = memref.load %arg2[%c44_226] : memref<72xf32, #tpu.memory_space<smem>>
    %677 = vector.broadcast %676 : f32 to vector<8x8xf32>
    %678 = arith.mulf %677, %442 : vector<8x8xf32>
    %679 = arith.addf %675, %678 : vector<8x8xf32>
    %c4_227 = arith.constant 4 : index
    %680 = memref.load %arg3[%c4_227] : memref<8xf32, #tpu.memory_space<smem>>
    %681 = vector.broadcast %680 : f32 to vector<8x8xf32>
    %682 = arith.addf %679, %681 : vector<8x8xf32>
    %cst_228 = arith.constant 0.000000e+00 : f32
    %cst_229 = arith.constant 2.000000e+01 : f32
    %683 = vector.broadcast %cst_228 : f32 to vector<8x8xf32>
    %684 = arith.maximumf %683, %682 : vector<8x8xf32>
    %685 = vector.broadcast %cst_229 : f32 to vector<8x8xf32>
    %686 = arith.minimumf %685, %684 : vector<8x8xf32>
    %cst_230 = arith.constant 0.000000e+00 : f32
    %687 = vector.broadcast %cst_230 : f32 to vector<8x8xf32>
    %688 = arith.select %424, %686, %687 : vector<8x8xi1>, vector<8x8xf32>
    %689 = arith.truncf %688 : vector<8x8xf32> to vector<8x8xbf16>
    %c1_231 = arith.constant 1 : index
    %c4_232 = arith.constant 4 : index
    %c0_233 = arith.constant 0 : index
    %c0_234 = arith.constant 0 : index
    %690 = vector.load %arg4[%c1_231, %c4_232, %c0_233, %c0_234] : memref<2x8x8x8xbf16, #tpu.memory_space<vmem>>, vector<1x1x8x8xbf16>
    %691 = vector.shape_cast %690 : vector<1x1x8x8xbf16> to vector<8x8xbf16>
    %692 = vector.shape_cast %689 : vector<8x8xbf16> to vector<1x1x8x8xbf16>
    tpu.vector_store %arg4[%c1_231, %c4_232, %c0_233, %c0_234], %692 {strides = array<i32>} : memref<2x8x8x8xbf16, #tpu.memory_space<vmem>>, vector<1x1x8x8xbf16>,
    %cst_235 = arith.constant 0.000000e+00 : f32
    %693 = vector.broadcast %cst_235 : f32 to vector<8x8xf32>
    %c45_236 = arith.constant 45 : index
    %694 = memref.load %arg2[%c45_236] : memref<72xf32, #tpu.memory_space<smem>>
    %695 = vector.broadcast %694 : f32 to vector<8x8xf32>
    %696 = arith.mulf %695, %426 : vector<8x8xf32>
    %697 = arith.addf %693, %696 : vector<8x8xf32>
    %c46_237 = arith.constant 46 : index
    %698 = memref.load %arg2[%c46_237] : memref<72xf32, #tpu.memory_space<smem>>
    %699 = vector.broadcast %698 : f32 to vector<8x8xf32>
    %700 = arith.mulf %699, %428 : vector<8x8xf32>
    %701 = arith.addf %697, %700 : vector<8x8xf32>
    %c47_238 = arith.constant 47 : index
    %702 = memref.load %arg2[%c47_238] : memref<72xf32, #tpu.memory_space<smem>>
    %703 = vector.broadcast %702 : f32 to vector<8x8xf32>
    %704 = arith.mulf %703, %430 : vector<8x8xf32>
    %705 = arith.addf %701, %704 : vector<8x8xf32>
    %c48_239 = arith.constant 48 : index
    %706 = memref.load %arg2[%c48_239] : memref<72xf32, #tpu.memory_space<smem>>
    %707 = vector.broadcast %706 : f32 to vector<8x8xf32>
    %708 = arith.mulf %707, %432 : vector<8x8xf32>
    %709 = arith.addf %705, %708 : vector<8x8xf32>
    %c49_240 = arith.constant 49 : index
    %710 = memref.load %arg2[%c49_240] : memref<72xf32, #tpu.memory_space<smem>>
    %711 = vector.broadcast %710 : f32 to vector<8x8xf32>
    %712 = arith.mulf %711, %434 : vector<8x8xf32>
    %713 = arith.addf %709, %712 : vector<8x8xf32>
    %c50_241 = arith.constant 50 : index
    %714 = memref.load %arg2[%c50_241] : memref<72xf32, #tpu.memory_space<smem>>
    %715 = vector.broadcast %714 : f32 to vector<8x8xf32>
    %716 = arith.mulf %715, %436 : vector<8x8xf32>
    %717 = arith.addf %713, %716 : vector<8x8xf32>
    %c51_242 = arith.constant 51 : index
    %718 = memref.load %arg2[%c51_242] : memref<72xf32, #tpu.memory_space<smem>>
    %719 = vector.broadcast %718 : f32 to vector<8x8xf32>
    %720 = arith.mulf %719, %438 : vector<8x8xf32>
    %721 = arith.addf %717, %720 : vector<8x8xf32>
    %c52_243 = arith.constant 52 : index
    %722 = memref.load %arg2[%c52_243] : memref<72xf32, #tpu.memory_space<smem>>
    %723 = vector.broadcast %722 : f32 to vector<8x8xf32>
    %724 = arith.mulf %723, %440 : vector<8x8xf32>
    %725 = arith.addf %721, %724 : vector<8x8xf32>
    %c53_244 = arith.constant 53 : index
    %726 = memref.load %arg2[%c53_244] : memref<72xf32, #tpu.memory_space<smem>>
    %727 = vector.broadcast %726 : f32 to vector<8x8xf32>
    %728 = arith.mulf %727, %442 : vector<8x8xf32>
    %729 = arith.addf %725, %728 : vector<8x8xf32>
    %c5_245 = arith.constant 5 : index
    %730 = memref.load %arg3[%c5_245] : memref<8xf32, #tpu.memory_space<smem>>
    %731 = vector.broadcast %730 : f32 to vector<8x8xf32>
    %732 = arith.addf %729, %731 : vector<8x8xf32>
    %cst_246 = arith.constant 0.000000e+00 : f32
    %cst_247 = arith.constant 2.000000e+01 : f32
    %733 = vector.broadcast %cst_246 : f32 to vector<8x8xf32>
    %734 = arith.maximumf %733, %732 : vector<8x8xf32>
    %735 = vector.broadcast %cst_247 : f32 to vector<8x8xf32>
    %736 = arith.minimumf %735, %734 : vector<8x8xf32>
    %cst_248 = arith.constant 0.000000e+00 : f32
    %737 = vector.broadcast %cst_248 : f32 to vector<8x8xf32>
    %738 = arith.select %424, %736, %737 : vector<8x8xi1>, vector<8x8xf32>
    %739 = arith.truncf %738 : vector<8x8xf32> to vector<8x8xbf16>
    %c1_249 = arith.constant 1 : index
    %c5_250 = arith.constant 5 : index
    %c0_251 = arith.constant 0 : index
    %c0_252 = arith.constant 0 : index
    %740 = vector.load %arg4[%c1_249, %c5_250, %c0_251, %c0_252] : memref<2x8x8x8xbf16, #tpu.memory_space<vmem>>, vector<1x1x8x8xbf16>
    %741 = vector.shape_cast %740 : vector<1x1x8x8xbf16> to vector<8x8xbf16>
    %742 = vector.shape_cast %739 : vector<8x8xbf16> to vector<1x1x8x8xbf16>
    tpu.vector_store %arg4[%c1_249, %c5_250, %c0_251, %c0_252], %742 {strides = array<i32>} : memref<2x8x8x8xbf16, #tpu.memory_space<vmem>>, vector<1x1x8x8xbf16>,
    %cst_253 = arith.constant 0.000000e+00 : f32
    %743 = vector.broadcast %cst_253 : f32 to vector<8x8xf32>
    %c54_254 = arith.constant 54 : index
    %744 = memref.load %arg2[%c54_254] : memref<72xf32, #tpu.memory_space<smem>>
    %745 = vector.broadcast %744 : f32 to vector<8x8xf32>
    %746 = arith.mulf %745, %426 : vector<8x8xf32>
    %747 = arith.addf %743, %746 : vector<8x8xf32>
    %c55_255 = arith.constant 55 : index
    %748 = memref.load %arg2[%c55_255] : memref<72xf32, #tpu.memory_space<smem>>
    %749 = vector.broadcast %748 : f32 to vector<8x8xf32>
    %750 = arith.mulf %749, %428 : vector<8x8xf32>
    %751 = arith.addf %747, %750 : vector<8x8xf32>
    %c56_256 = arith.constant 56 : index
    %752 = memref.load %arg2[%c56_256] : memref<72xf32, #tpu.memory_space<smem>>
    %753 = vector.broadcast %752 : f32 to vector<8x8xf32>
    %754 = arith.mulf %753, %430 : vector<8x8xf32>
    %755 = arith.addf %751, %754 : vector<8x8xf32>
    %c57_257 = arith.constant 57 : index
    %756 = memref.load %arg2[%c57_257] : memref<72xf32, #tpu.memory_space<smem>>
    %757 = vector.broadcast %756 : f32 to vector<8x8xf32>
    %758 = arith.mulf %757, %432 : vector<8x8xf32>
    %759 = arith.addf %755, %758 : vector<8x8xf32>
    %c58_258 = arith.constant 58 : index
    %760 = memref.load %arg2[%c58_258] : memref<72xf32, #tpu.memory_space<smem>>
    %761 = vector.broadcast %760 : f32 to vector<8x8xf32>
    %762 = arith.mulf %761, %434 : vector<8x8xf32>
    %763 = arith.addf %759, %762 : vector<8x8xf32>
    %c59_259 = arith.constant 59 : index
    %764 = memref.load %arg2[%c59_259] : memref<72xf32, #tpu.memory_space<smem>>
    %765 = vector.broadcast %764 : f32 to vector<8x8xf32>
    %766 = arith.mulf %765, %436 : vector<8x8xf32>
    %767 = arith.addf %763, %766 : vector<8x8xf32>
    %c60_260 = arith.constant 60 : index
    %768 = memref.load %arg2[%c60_260] : memref<72xf32, #tpu.memory_space<smem>>
    %769 = vector.broadcast %768 : f32 to vector<8x8xf32>
    %770 = arith.mulf %769, %438 : vector<8x8xf32>
    %771 = arith.addf %767, %770 : vector<8x8xf32>
    %c61_261 = arith.constant 61 : index
    %772 = memref.load %arg2[%c61_261] : memref<72xf32, #tpu.memory_space<smem>>
    %773 = vector.broadcast %772 : f32 to vector<8x8xf32>
    %774 = arith.mulf %773, %440 : vector<8x8xf32>
    %775 = arith.addf %771, %774 : vector<8x8xf32>
    %c62_262 = arith.constant 62 : index
    %776 = memref.load %arg2[%c62_262] : memref<72xf32, #tpu.memory_space<smem>>
    %777 = vector.broadcast %776 : f32 to vector<8x8xf32>
    %778 = arith.mulf %777, %442 : vector<8x8xf32>
    %779 = arith.addf %775, %778 : vector<8x8xf32>
    %c6_263 = arith.constant 6 : index
    %780 = memref.load %arg3[%c6_263] : memref<8xf32, #tpu.memory_space<smem>>
    %781 = vector.broadcast %780 : f32 to vector<8x8xf32>
    %782 = arith.addf %779, %781 : vector<8x8xf32>
    %cst_264 = arith.constant 0.000000e+00 : f32
    %cst_265 = arith.constant 2.000000e+01 : f32
    %783 = vector.broadcast %cst_264 : f32 to vector<8x8xf32>
    %784 = arith.maximumf %783, %782 : vector<8x8xf32>
    %785 = vector.broadcast %cst_265 : f32 to vector<8x8xf32>
    %786 = arith.minimumf %785, %784 : vector<8x8xf32>
    %cst_266 = arith.constant 0.000000e+00 : f32
    %787 = vector.broadcast %cst_266 : f32 to vector<8x8xf32>
    %788 = arith.select %424, %786, %787 : vector<8x8xi1>, vector<8x8xf32>
    %789 = arith.truncf %788 : vector<8x8xf32> to vector<8x8xbf16>
    %c1_267 = arith.constant 1 : index
    %c6_268 = arith.constant 6 : index
    %c0_269 = arith.constant 0 : index
    %c0_270 = arith.constant 0 : index
    %790 = vector.load %arg4[%c1_267, %c6_268, %c0_269, %c0_270] : memref<2x8x8x8xbf16, #tpu.memory_space<vmem>>, vector<1x1x8x8xbf16>
    %791 = vector.shape_cast %790 : vector<1x1x8x8xbf16> to vector<8x8xbf16>
    %792 = vector.shape_cast %789 : vector<8x8xbf16> to vector<1x1x8x8xbf16>
    tpu.vector_store %arg4[%c1_267, %c6_268, %c0_269, %c0_270], %792 {strides = array<i32>} : memref<2x8x8x8xbf16, #tpu.memory_space<vmem>>, vector<1x1x8x8xbf16>,
    %cst_271 = arith.constant 0.000000e+00 : f32
    %793 = vector.broadcast %cst_271 : f32 to vector<8x8xf32>
    %c63_272 = arith.constant 63 : index
    %794 = memref.load %arg2[%c63_272] : memref<72xf32, #tpu.memory_space<smem>>
    %795 = vector.broadcast %794 : f32 to vector<8x8xf32>
    %796 = arith.mulf %795, %426 : vector<8x8xf32>
    %797 = arith.addf %793, %796 : vector<8x8xf32>
    %c64_273 = arith.constant 64 : index
    %798 = memref.load %arg2[%c64_273] : memref<72xf32, #tpu.memory_space<smem>>
    %799 = vector.broadcast %798 : f32 to vector<8x8xf32>
    %800 = arith.mulf %799, %428 : vector<8x8xf32>
    %801 = arith.addf %797, %800 : vector<8x8xf32>
    %c65_274 = arith.constant 65 : index
    %802 = memref.load %arg2[%c65_274] : memref<72xf32, #tpu.memory_space<smem>>
    %803 = vector.broadcast %802 : f32 to vector<8x8xf32>
    %804 = arith.mulf %803, %430 : vector<8x8xf32>
    %805 = arith.addf %801, %804 : vector<8x8xf32>
    %c66_275 = arith.constant 66 : index
    %806 = memref.load %arg2[%c66_275] : memref<72xf32, #tpu.memory_space<smem>>
    %807 = vector.broadcast %806 : f32 to vector<8x8xf32>
    %808 = arith.mulf %807, %432 : vector<8x8xf32>
    %809 = arith.addf %805, %808 : vector<8x8xf32>
    %c67_276 = arith.constant 67 : index
    %810 = memref.load %arg2[%c67_276] : memref<72xf32, #tpu.memory_space<smem>>
    %811 = vector.broadcast %810 : f32 to vector<8x8xf32>
    %812 = arith.mulf %811, %434 : vector<8x8xf32>
    %813 = arith.addf %809, %812 : vector<8x8xf32>
    %c68_277 = arith.constant 68 : index
    %814 = memref.load %arg2[%c68_277] : memref<72xf32, #tpu.memory_space<smem>>
    %815 = vector.broadcast %814 : f32 to vector<8x8xf32>
    %816 = arith.mulf %815, %436 : vector<8x8xf32>
    %817 = arith.addf %813, %816 : vector<8x8xf32>
    %c69_278 = arith.constant 69 : index
    %818 = memref.load %arg2[%c69_278] : memref<72xf32, #tpu.memory_space<smem>>
    %819 = vector.broadcast %818 : f32 to vector<8x8xf32>
    %820 = arith.mulf %819, %438 : vector<8x8xf32>
    %821 = arith.addf %817, %820 : vector<8x8xf32>
    %c70_279 = arith.constant 70 : index
    %822 = memref.load %arg2[%c70_279] : memref<72xf32, #tpu.memory_space<smem>>
    %823 = vector.broadcast %822 : f32 to vector<8x8xf32>
    %824 = arith.mulf %823, %440 : vector<8x8xf32>
    %825 = arith.addf %821, %824 : vector<8x8xf32>
    %c71_280 = arith.constant 71 : index
    %826 = memref.load %arg2[%c71_280] : memref<72xf32, #tpu.memory_space<smem>>
    %827 = vector.broadcast %826 : f32 to vector<8x8xf32>
    %828 = arith.mulf %827, %442 : vector<8x8xf32>
    %829 = arith.addf %825, %828 : vector<8x8xf32>
    %c7_281 = arith.constant 7 : index
    %830 = memref.load %arg3[%c7_281] : memref<8xf32, #tpu.memory_space<smem>>
    %831 = vector.broadcast %830 : f32 to vector<8x8xf32>
    %832 = arith.addf %829, %831 : vector<8x8xf32>
    %cst_282 = arith.constant 0.000000e+00 : f32
    %cst_283 = arith.constant 2.000000e+01 : f32
    %833 = vector.broadcast %cst_282 : f32 to vector<8x8xf32>
    %834 = arith.maximumf %833, %832 : vector<8x8xf32>
    %835 = vector.broadcast %cst_283 : f32 to vector<8x8xf32>
    %836 = arith.minimumf %835, %834 : vector<8x8xf32>
    %cst_284 = arith.constant 0.000000e+00 : f32
    %837 = vector.broadcast %cst_284 : f32 to vector<8x8xf32>
    %838 = arith.select %424, %836, %837 : vector<8x8xi1>, vector<8x8xf32>
    %839 = arith.truncf %838 : vector<8x8xf32> to vector<8x8xbf16>
    %c1_285 = arith.constant 1 : index
    %c7_286 = arith.constant 7 : index
    %c0_287 = arith.constant 0 : index
    %c0_288 = arith.constant 0 : index
    %840 = vector.load %arg4[%c1_285, %c7_286, %c0_287, %c0_288] : memref<2x8x8x8xbf16, #tpu.memory_space<vmem>>, vector<1x1x8x8xbf16>
    %841 = vector.shape_cast %840 : vector<1x1x8x8xbf16> to vector<8x8xbf16>
    %842 = vector.shape_cast %839 : vector<8x8xbf16> to vector<1x1x8x8xbf16>
    tpu.vector_store %arg4[%c1_285, %c7_286, %c0_287, %c0_288], %842 {strides = array<i32>} : memref<2x8x8x8xbf16, #tpu.memory_space<vmem>>, vector<1x1x8x8xbf16>,
    return
  }
}

</mosaic_0001>

<bundles_post_ra>
// kernel: tpu_custom_call.1
= control target key start
LH: loop header
LB: loop body
LE: loop exit
PB: predicated region body
PF: predicated region fallthrough
CT: control target
= control target key end

     0   :  { %9 = vsyncpa [#allocation4], 0  ;;  %s2192_s0 = inlined_call_operand.vmem [shape: s32[2], index: 0, kind: input, shape index: {}]   ;;  %s2193_s1 = inlined_call_operand.vmem [shape: f32[2,4,9,9], index: 1, kind: input, shape index: {}]   ;;  %s2194_s2 = inlined_call_operand.vmem [shape: f32[72], index: 2, kind: input, shape index: {}]   ;;  %s2195_s3 = inlined_call_operand.vmem [shape: f32[8], index: 3, kind: input, shape index: {}]   ;;  %s2196_s4 = inlined_call_operand.hbm [shape: bf16[2,8,8,8], index: 4, kind: output, shape index: {}]  }
   0x1   :  { %10 = vsyncpa [#allocation6], 0  ;;  %s30_s17 = sshll.u32 %s2194_s2, 4  ;;  %s31_s17 = int_to_ptr.vmem [resolvable:$true] %s30_s17 }
   0x2   :  { %11 = vsyncpa [#allocation3], 0  ;;  %s18_s20 = sshll.u32 %s2192_s0, 4  ;;  %s1185_s21 = scalar_lea.vmem %s31_s17, 16  ;;  %s19_s20 = int_to_ptr.vmem [resolvable:$true] %s18_s20 }
   0x3   :  { %p1186_p0 = scmp.ne.s32.totalorder %s31_s17, %s1185_s21  ;;  %p1190_p1 = scmp.lt.s32.totalorder %s31_s17, %s31_s17 }
   0x4   :  { %p1191_p2 = scmp.lt.s32.totalorder %s1185_s21, %s1185_s21 }
   0x6   :  { %p1192_p3 = por %p1191_p2, %p1190_p1 }
   0x8   :  { %p1193_p4 = pnand %p1192_p3, %p1186_p0 }
   0xa   :  { %1196 = shalt.err (!%p1193_p4)
}
   0xb   :  { %s1249_s22 = smov [#allocation5]   ;;  %s1197_s23 = scalar_lea.vmem %s19_s20, 16 }
   0xc   :  { %33 = dma.vmem_to_smem %s31_s17, 16, %s1249_s22, [#allocation6]  }
   0xd   :  { %p1198_p5 = scmp.ne.s32.totalorder %s19_s20, %s1197_s23  ;;  %p1202_p6 = scmp.lt.s32.totalorder %s19_s20, %s19_s20 }
   0xe   :  { %p1203_p7 = scmp.lt.s32.totalorder %s1197_s23, %s1197_s23 }
  0x10   :  { %p1204_p8 = por %p1203_p7, %p1202_p6 }
  0x12   :  { %p1205_p9 = pnand %p1204_p8, %p1198_p5 }
  0x14   :  { %1208 = shalt.err (!%p1205_p9)
}
  0x15   :  { %s1250_s2 = smov [#allocation2]   ;;  %s40_s25 = sshll.u32 %s2195_s3, 4  ;;  %s41_s25 = int_to_ptr.vmem [resolvable:$true] %s40_s25 }
  0x16   :  { %21 = dma.vmem_to_smem %s19_s20, 16, %s1250_s2, [#allocation4]  }
  0x17   :  { %s1209_s26 = scalar_lea.vmem %s41_s25, 16  ;;  %p1214_p11 = scmp.lt.s32.totalorder %s41_s25, %s41_s25 }
  0x18   :  { %p1210_p10 = scmp.ne.s32.totalorder %s41_s25, %s1209_s26  ;;  %p1215_p12 = scmp.lt.s32.totalorder %s1209_s26, %s1209_s26 }
  0x1a   :  { %p1216_p13 = por %p1215_p12, %p1214_p11 }
  0x1c   :  { %p1217_p0 = pnand %p1216_p13, %p1210_p10 }
  0x1e   :  { %1220 = shalt.err (!%p1217_p0)
}
  0x1f   :  { %s1251_s27 = smov [#allocation7]  }
  0x20   :  { %43 = dma.vmem_to_smem %s41_s25, 16, %s1251_s27, [#allocation6]  }
  0x21   :  { %1243 = dma.done.wait [#allocation4], 16  }
  0x22   :  { %1244 = vsyncadd [#allocation4], 4294967280 }
  0x23   :  { %1245 = dma.done.wait [#allocation6], 32  }
  0x24   :  { %1246 = vsyncadd [#allocation6], 4294967264 }
  0x25   :  { %53 = sfence }
  0x26   :  { %s1290_s28 = sld [smem:[#allocation5 + $0x8]]  ;;  %s1292_s3 = sld [smem:[#allocation5 + $0x2]]  ;;  %v1305_v0 = vld [vmem:[%s2193_s1 + $0x1] sm:$0xff]  ;;  %v1411_v34 = vld [vmem:[%s2193_s1 + $0x50] sm:$0xff]  ;;  %vm123_vm1 = vcmask 60416  }
  0x27   :  { %s1294_s29 = sld [smem:[#allocation5 + $0xb]]  ;;  %s1296_s30 = sld [smem:[#allocation5 + $0x5]]  ;;  %v1310_v1 = vld [vmem:[%s2193_s1] sm:$0xff]  ;;  %v1435_v42 = vld [vmem:[%s2193_s1 + $0x10] sm:$0xff] }
  0x28   :  { %s1298_s5 = sld [smem:[#allocation5 + $0x11]]  ;;  %s1300_s6 = sld [smem:[#allocation5 + $0xe]]  ;;  %v1323_v6 = vld [vmem:[%s2193_s1 + $0x20] sm:$0xff] }
  0x29   :  { %s1313_s11 = sld [smem:[#allocation5 + $0x1d]]  ;;  %s1325_s14 = sld [smem:[#allocation5 + $0x14]]  ;;  %v1376_v27 = vld [vmem:[%s2193_s1 + $0x40] sm:$0xff] }
  0x2a   :  { %s1252_s15 = smov 127   ;;  %s1336_s16 = sld [smem:[#allocation5 + $0x2f]]  ;;  %v1430_v41 = vld [vmem:[%s2193_s1 + $0x60] sm:$0xff] }
  0x2b   :  { %s1339_s17 = sld [smem:[#allocation5 + $0x26]]  ;;  %s1350_s18 = sld [smem:[#allocation5 + $0x41]] }
  0x2c   :  { %v109_v2 = vstv %s1290_s28  ;;  %v77_v4 = vstv %s1292_s3  ;;  %s1353_s19 = sld [smem:[#allocation5 + $0x38]]  ;;  %s1363_s20 = sld [smem:[#allocation5 + $0x9]] }
  0x2d   :  { %v110_v3 = vmul.f32 %v109_v2, %v1305_v0  ;;  %v134_v5 = vstv %s1294_s29  ;;  %v78_v7 = vmul.f32 %v77_v4, %v1310_v1  ;;  %v93_v8 = vstv %s1296_s30  ;;  %s1381_s23 = sld [smem:[#allocation5 + $0xa]]  ;;  %s1388_s2 = sld [smem:[#allocation5 + $0x20]] }
  0x2e   :  { %v135_v9 = vmul.f32 %v134_v5, %v1310_v1  ;;  %v94_v10 = vmul.f32 %v1323_v6, %v93_v8  ;;  %v166_v11 = vstv %s1298_s5  ;;  %v150_v12 = vstv %s1300_s6  ;;  %s1390_s0 = sld [smem:[#allocation5 + $0x36]]  ;;  %s1392_s24 = sld [smem:[#allocation5 + $0x37]] }
  0x2f   :  { %112 = vrot.lane.b32.xlu1 %v110_v3, %s1252_s15  ;;  %80 = vrot.lane.b32.xlu0 %v78_v7, %s1252_s15  ;;  %v167_v13 = vmul.f32 %v166_v11, %v1305_v0  ;;  %v151_v14 = vmul.f32 %v1323_v6, %v150_v12  ;;  %v248_v15 = vstv %s1313_s11  ;;  %v191_v16 = vstv %s1325_s14  ;;  %s1396_s25 = sld [smem:[#allocation5]]  ;;  %s1398_s26 = sld [smem:[#allocation5 + $0xc]] }
  0x30   :  { %v249_v17 = vmul.f32 %v248_v15, %v1310_v1  ;;  %v192_v18 = vmul.f32 %v191_v16, %v1310_v1  ;;  %v362_v19 = vstv %s1336_s16  ;;  %v604_v28 = vmul.f32 %v1376_v27, %v134_v5  ;;  %s1402_s27 = sld [smem:[#allocation5 + $0x1]]  ;;  %s1404_s3 = sld [smem:[#allocation5 + $0x17]] }
  0x31   :  { %v305_v20 = vstv %s1339_s17  ;;  %v363_v21 = vmul.f32 %v362_v19, %v1310_v1  ;;  %v476_v23 = vstv %s1350_s18  ;;  %v547_v30 = vmul.f32 %v1376_v27, %v77_v4  ;;  %s1406_s29 = sld [smem:[#allocation5 + $0x3]]  ;;  %s1418_s9 = sld [smem:[#allocation5 + $0x32]] }
  0x32   :  { %v306_v22 = vmul.f32 %v305_v20, %v1310_v1  ;;  %v419_v24 = vstv %s1353_s19  ;;  %v477_v25 = vmul.f32 %v476_v23, %v1310_v1  ;;  %v126_v29 = vstv %s1363_s20  ;;  %s1423_s10 = sld [smem:[#allocation5 + $0x29]]  ;;  %s1447_s16 = sld [smem:[#allocation5 + $0x44]] }
  0x33   :  { %137 = vrot.lane.b32.xlu1 %v135_v9, %s1252_s15  ;;  %96 = vrot.lane.b32.xlu0 %v94_v10, %s1252_s15  ;;  %v420_v26 = vmul.f32 %v419_v24, %v1310_v1  ;;  %v596_v31 = vmul.f32 %v1376_v27, %v126_v29  ;;  %v718_v32 = vmul.f32 %v1376_v27, %v248_v15  ;;  %v130_v36 = vstv %s1381_s23  ;;  %s1461_s17 = sld [smem:[#allocation5 + $0x3b]]  ;;  %s1485_s18 = sld [smem:[#allocation5 + $0xf]] }
  0x34   :  { %v661_v33 = vmul.f32 %v1376_v27, %v191_v16  ;;  %v832_v35 = vmul.f32 %v1376_v27, %v362_v19  ;;  %v775_v37 = vmul.f32 %v1376_v27, %v305_v20  ;;  %v600_v38 = vmul.f32 %v1411_v34, %v130_v36  ;;  %s1487_s19 = sld [smem:[#allocation5 + $0x6]]  ;;  %s1528_s6 = sld [smem:[#allocation5 + $0x23]] }
  0x35   :  { %v946_v39 = vmul.f32 %v1376_v27, %v476_v23  ;;  %v889_v40 = vmul.f32 %v1376_v27, %v419_v24  ;;  %v411_v43 = vstv %s1390_s0  ;;  %v415_v44 = vstv %s1392_s24  ;;  %s1536_s30 = sld [smem:[#allocation5 + $0x35]]  ;;  %s1545_s7 = sld [smem:[#allocation5 + $0x47]] }
  0x36   :  { %v264_v45 = vstv %s1388_s2  ;;  %v69_v46 = vstv %s1396_s25  ;;  %v142_v47 = vstv %s1398_s26  ;;  %v412_v48 = vmul.f32 %v411_v43, %v1310_v1  ;;  %s1530_s2 = sld [smem:[#allocation5 + $0x1a]]  ;;  %s1548_s8 = sld [smem:[#allocation5 + $0x3e]] }
  0x37   :  { %169 = vrot.lane.b32.xlu1 %v167_v13, %s1252_s15  ;;  %153 = vrot.lane.b32.xlu0 %v151_v14, %s1252_s15  ;;  %v73_v49 = vstv %s1402_s27  ;;  %v416_v50 = vmul.f32 %v1435_v42, %v415_v44  ;;  %v1453_v51 = vadd.f32 %v600_v38, %v596_v31  ;;  %v1458_v52 = vmul.f32 %v1430_v41, %v142_v47  ;;  %v1502_v13 = vld [vmem:[%s2193_s1 + $0x41] sm:$0xff]  ;;  %s1588_s28 = sld [smem:[#allocation5 + $0x4]]  ;;  %s1590_s5 = sld [smem:[#allocation5 + $0x7]] }
  0x38   :  { %v207_v53 = vstv %s1404_s3  ;;  %v85_v54 = vstv %s1406_s29  ;;  %v539_v55 = vmul.f32 %v1376_v27, %v69_v46  ;;  %v543_v56 = vmul.f32 %v1411_v34, %v73_v49  ;;  %s1538_s3 = sld [smem:[#allocation5 + $0x2c]]  ;;  %s1598_s12 = sld [smem:[#allocation5 + $0x12]] }
  0x39   :  { %v1470_v57 = vadd.f32 %v416_v50, %v412_v48  ;;  %v1475_v58 = vmul.f32 %v1430_v41, %v85_v54  ;;  %v265_v59 = vmul.f32 %v1323_v6, %v264_v45  ;;  %v208_v61 = vmul.f32 %v1323_v6, %v207_v53  ;;  %s1596_s11 = sld [smem:[#allocation5 + $0x1c]]  ;;  %s1608_s13 = sld [smem:[#allocation7]] }
  0x3a   :  { %v1479_v60 = vadd.f32 %v543_v56, %v539_v55  ;;  %v378_v62 = vstv %s1418_s9  ;;  %v321_v63 = vstv %s1423_s10  ;;  %v492_v5 = vstv %s1447_s16  ;;  %s1592_s9 = sld [smem:[#allocation5 + $0xd]]  ;;  %s1594_s10 = sld [smem:[#allocation5 + $0x1b]] }
  0x3b   :  { %251 = vrot.lane.b32.xlu1 %v249_v17, %s1252_s15  ;;  %194 = vrot.lane.b32.xlu0 %v192_v18, %s1252_s15  ;;  %v379_v3 = vmul.f32 %v1323_v6, %v378_v62  ;;  %v322_v4 = vmul.f32 %v1323_v6, %v321_v63  ;;  %v435_v7 = vstv %s1461_s17  ;;  %v493_v9 = vmul.f32 %v1323_v6, %v492_v5  ;;  %s1610_s14 = sld [smem:[#allocation2]]  ;;  %s1618_s27 = sld [smem:[#allocation5 + $0x2d]] }
  0x3c   :  { %v436_v10 = vmul.f32 %v1323_v6, %v435_v7  ;;  %v158_v14 = vstv %s1485_s18  ;;  %v101_v15 = vstv %s1487_s19  ;;  %v620_v17 = vmul.f32 %v1430_v41, %v150_v12  ;;  %s1620_s25 = sld [smem:[#allocation5 + $0x2e]]  ;;  %s1622_s16 = sld [smem:[#allocation5 + $0x10]] }
  0x3d   :  { %v1509_v16 = vmul.f32 %v1502_v13, %v158_v14  ;;  %v1518_v18 = vmul.f32 %v1502_v13, %v101_v15  ;;  %v563_v19 = vmul.f32 %v1430_v41, %v93_v8  ;;  %v734_v20 = vmul.f32 %v1430_v41, %v264_v45  ;;  %s1624_s17 = sld [smem:[#allocation5 + $0x24]]  ;;  %s1632_s20 = sld [smem:[#allocation5 + $0x1e]] }
  0x3e   :  { %v848_v12 = vmul.f32 %v1430_v41, %v378_v62  ;;  %v791_v8 = vmul.f32 %v1430_v41, %v321_v63  ;;  %v905_v23 = vmul.f32 %v1430_v41, %v435_v7  ;;  %v280_v24 = vstv %s1528_s6  ;;  %s1634_s23 = sld [smem:[#allocation5 + $0x25]]  ;;  %s1662_s29 = sld [smem:[#allocation5 + $0x3f]] }
  0x3f   :  { %365 = vrot.lane.b32.xlu1 %v363_v21, %s1252_s15  ;;  %308 = vrot.lane.b32.xlu0 %v306_v22, %s1252_s15  ;;  %v677_v21 = vmul.f32 %v1430_v41, %v207_v53  ;;  %v962_v22 = vmul.f32 %v1430_v41, %v492_v5  ;;  %v337_v31 = vstv %s1538_s3  ;;  %v579_v45 = vmul.f32 %v1502_v13, %v109_v2  ;;  %s1664_s3 = sld [smem:[#allocation5 + $0x40]]  ;;  %s1687_s19 = sld [smem:[#allocation5 + $0x27]] }
  0x40   :  { %v750_v48 = vmul.f32 %v1502_v13, %v280_v24  ;;  %v74_v56 = vmul.f32 %v1435_v42, %v73_v49  ;;  %v131_v62 = vmul.f32 %v1435_v42, %v130_v36  ;;  %v127_v63 = vmul.f32 %v126_v29, %v1310_v1  ;;  %v1629_v36 = vld [vmem:[%s2193_s1 + $0x30] sm:$0xff]  ;;  %s1685_s26 = sld [smem:[#allocation5 + $0x30]]  ;;  %s1713_s18 = sld [smem:[#allocation5 + $0x39]] }
  0x41   :  { %v89_v49 = vstv %s1588_s28  ;;  %v2197_v5 = vstv %s1590_s5  ;;  %s1844_s28 = sld [smem:[#allocation5 + $0x18]]  ;;  %s1876_s0 = sld [smem:[#allocation5 + $0x43]] }
  0x42   :  { %s1879_s24 = sld [smem:[#allocation5 + $0x2a]]  ;;  %s1900_s21 = sld [smem:[#allocation5 + $0x45]] }
  0x43   :  { %479 = vrot.lane.b32.xlu1 %v477_v25, %s1252_s15  ;;  %422 = vrot.lane.b32.xlu0 %v420_v26, %s1252_s15  ;;  %v223_v25 = vstv %s1530_s2  ;;  %v281_v26 = vmul.f32 %v280_v24, %v1305_v0  ;;  %s1903_s22 = sld [smem:[#allocation5 + $0x3c]]  ;;  %s1972_s2 = sld [smem:[#allocation5 + $0x22]] }
  0x44   :  { %v693_v50 = vmul.f32 %v1502_v13, %v223_v25 }
  0x47   :  { %606 = vrot.lane.b32.xlu1 %v604_v28, %s1252_s15  ;;  %549 = vrot.lane.b32.xlu0 %v547_v30, %s1252_s15  ;;  %v224_v28 = vmul.f32 %v223_v25, %v1305_v0  ;;  %v394_v30 = vstv %s1536_s30  ;;  %s1650_s30 = sld [smem:[#allocation5 + $0x15]]  ;;  %v117_v25 = vstv %s1608_s13  ;;  %s1253_s13 = smov [#allocation8]  }
  0x48   :  { %v864_v53 = vmul.f32 %v1502_v13, %v394_v30 }
  0x4b   :  { %720 = vrot.lane.b32.xlu1 %v718_v32, %s1252_s15  ;;  %663 = vrot.lane.b32.xlu0 %v661_v33, %s1252_s15  ;;  %v395_v32 = vmul.f32 %v394_v30, %v1305_v0  ;;  %v338_v33 = vmul.f32 %v337_v31, %v1305_v0 }
  0x4f   :  { %834 = vrot.lane.b32.xlu1 %v832_v35, %s1252_s15  ;;  %777 = vrot.lane.b32.xlu0 %v775_v37, %s1252_s15  ;;  %v508_v35 = vstv %s1545_s7  ;;  %v451_v37 = vstv %s1548_s8  ;;  %s1699_s7 = sld [smem:[#allocation5 + $0x42]]  ;;  %s1702_s8 = sld [smem:[#allocation7 + $0x1]] }
  0x50   :  { %v509_v38 = vmul.f32 %v508_v35, %v1305_v0  ;;  %v978_v2 = vmul.f32 %v1502_v13, %v508_v35  ;;  %v921_v55 = vmul.f32 %v1502_v13, %v451_v37 }
  0x53   :  { %948 = vrot.lane.b32.xlu1 %v946_v39, %s1252_s15  ;;  %891 = vrot.lane.b32.xlu0 %v889_v40, %s1252_s15  ;;  %v452_v39 = vmul.f32 %v451_v37, %v1305_v0  ;;  %v636_v40 = vmul.f32 %v1502_v13, %v166_v11  ;;  %v807_v11 = vmul.f32 %v1502_v13, %v337_v31  ;;  %v354_v37 = vstv %s1618_s27  ;;  %s1834_s27 = sld [smem:[#allocation5 + $0x21]] }
  0x57   :  { %267 = vrot.lane.b32.xlu1 %v265_v59, %s1252_s15  ;;  %210 = vrot.lane.b32.xlu0 %v208_v61, %s1252_s15  ;;  %v70_v59 = vmul.f32 %v69_v46, %v1310_v1  ;;  %v54_v61 = vlaneseq }
  0x59   :  { %v75_v46 = vadd.f32 %v74_v56, %v70_v59  ;;  %v1647_v7 = vand.u32 127, %v54_v61  ;;  %v199_v59 = vstv %s1650_s30  ;;  %s2020_s30 = sld [smem:[#allocation5 + $0x46]] }
  0x5b   :  { %381 = vrot.lane.b32.xlu1 %v379_v3, %s1252_s15  ;;  %324 = vrot.lane.b32.xlu0 %v322_v4, %s1252_s15  ;;  %v86_v3 = vmul.f32 %v1323_v6, %v85_v54  ;;  %v1644_v4 = vld [vmem:[%s2193_s1 + $0x11] sm:$0xff]  ;;  %v244_v54 = vstv %s1596_s11 }
  0x5c   :  { %v106_v24 = vmul.f32 %v1644_v4, %v2197_v5  ;;  %v245_v31 = vmul.f32 %v1435_v42, %v244_v54 }
  0x5f   :  { %495 = vrot.lane.b32.xlu1 %v493_v9, %s1252_s15  ;;  %438 = vrot.lane.b32.xlu0 %v436_v10, %s1252_s15  ;;  %v146_v9 = vstv %s1592_s9  ;;  %s1846_s9 = sld [smem:[#allocation5 + $0x31]] }
  0x63   :  { %622 = vrot.lane.b32.xlu1 %v620_v17, %s1252_s15  ;;  %565 = vrot.lane.b32.xlu0 %v563_v19, %s1252_s15  ;;  %v132_v17 = vadd.f32 %v131_v62, %v127_v63  ;;  %v240_v19 = vstv %s1594_s10 }
  0x64   :  { %v241_v30 = vmul.f32 %v240_v19, %v1310_v1 }
  0x67   :  { %736 = vrot.lane.b32.xlu1 %v734_v20, %s1252_s15  ;;  %679 = vrot.lane.b32.xlu0 %v677_v21, %s1252_s15  ;;  %v183_v20 = vstv %s1598_s12  ;;  %s1810_s12 = sld [smem:[#allocation5 + $0x1f]] }
  0x6b   :  { %850 = vrot.lane.b32.xlu1 %v848_v12, %s1252_s15  ;;  %793 = vrot.lane.b32.xlu0 %v791_v8, %s1252_s15  ;;  %v143_v12 = vmul.f32 %v1323_v6, %v142_v47  ;;  %v90_v8 = vmul.f32 %v1629_v36, %v89_v49  ;;  %v147_v47 = vmul.f32 %v1629_v36, %v146_v9 }
  0x6f   :  { %964 = vrot.lane.b32.xlu1 %v962_v22, %s1252_s15  ;;  %907 = vrot.lane.b32.xlu0 %v905_v23, %s1252_s15  ;;  %v102_v23 = vmul.f32 %v101_v15, %v1305_v0  ;;  %v184_v15 = vmul.f32 %v183_v20, %v1310_v1 }
  0x73   :  { %283 = vrot.lane.b32.xlu1 %v281_v26, %s1252_s15  ;;  %226 = vrot.lane.b32.xlu0 %v224_v28, %s1252_s15 }
  0x77   :  { %397 = vrot.lane.b32.xlu1 %v395_v32, %s1252_s15  ;;  %340 = vrot.lane.b32.xlu0 %v338_v33, %s1252_s15 }
  0x7b   :  { %511 = vrot.lane.b32.xlu1 %v509_v38, %s1252_s15  ;;  %454 = vrot.lane.b32.xlu0 %v452_v39, %s1252_s15  ;;  %v358_v38 = vstv %s1620_s25  ;;  %v57_v39 = vstv %s1610_s14  ;;  %s1737_s14 = sld [smem:[#allocation5 + $0x3a]]  ;;  %s1851_s25 = sld [smem:[#allocation5 + $0x28]] }
  0x7c   :  { %v359_v61 = vmul.f32 %v1435_v42, %v358_v38  ;;  %vm1724_vm0 = vcmp.lt.s32.totalorder %v1647_v7, %v57_v39 }
  0x7f   :  { %638 = vrot.lane.b32.xlu1 %v636_v40, %s1252_s15  ;;  %581 = vrot.lane.b32.xlu0 %v579_v45, %s1252_s15  ;;  %v159_v45 = vmul.f32 %v158_v14, %v1305_v0  ;;  %v355_v14 = vmul.f32 %v354_v37, %v1310_v1 }
  0x83   :  { %752 = vrot.lane.b32.xlu1 %v750_v48, %s1252_s15  ;;  %695 = vrot.lane.b32.xlu0 %v693_v50, %s1252_s15  ;;  %v297_v48 = vstv %s1624_s17  ;;  %s1861_s17 = sld [smem:[#allocation5 + $0x33]] }
  0x87   :  { %866 = vrot.lane.b32.xlu1 %v864_v53, %s1252_s15  ;;  %809 = vrot.lane.b32.xlu0 %v807_v11, %s1252_s15  ;;  %v162_v53 = vstv %s1622_s16  ;;  %v256_v11 = vstv %s1632_s20  ;;  %s1918_s20 = sld [smem:[#allocation5 + $0x3d]]  ;;  %s2004_s16 = sld [smem:[#allocation5 + $0x2b]] }
  0x8b   :  { %980 = vrot.lane.b32.xlu1 %v978_v2, %s1252_s15  ;;  %923 = vrot.lane.b32.xlu0 %v921_v55, %s1252_s15  ;;  %s1606_s15 = sld [smem:[#allocation5 + $0x13]]  ;;  %v301_v2 = vstv %s1634_s23 }
  0x91   :  { %v187_v22 = vstv %s1606_s15  ;;  %s1819_s15 = sld [smem:[#allocation5 + $0x16]] }
  0x92   :  { %v188_v35 = vmul.f32 %v1435_v42, %v187_v22 }
  0xa1   :  { %v1636_v29 = vpop.permute.xlu1 %112  ;;  %v81_v10 = vpop.permute.xlu0 %80 }
  0xa2   :  { %v83_v21 = vadd.f32 %v81_v10, %v75_v46  ;;  %v246_v46 = vadd.f32 %v245_v31, %v241_v30  ;;  %v298_v10 = vmul.f32 %v297_v48, %v1310_v1  ;;  %v257_v30 = vmul.f32 %v1323_v6, %v256_v11 }
  0xa4   :  { %v87_v26 = vadd.f32 %v86_v3, %v83_v21  ;;  %v189_v3 = vadd.f32 %v188_v35, %v184_v15  ;;  %v302_v21 = vmul.f32 %v1435_v42, %v301_v2  ;;  %v313_v35 = vstv %s1687_s19  ;;  %s2054_s19 = sld [smem:[#allocation7 + $0x4]] }
  0xa5   :  { %v138_v28 = vpop.permute.xlu1 %137  ;;  %v97_v33 = vpop.permute.xlu0 %96 }
  0xa6   :  { %v140_v32 = vadd.f32 %v138_v28, %v132_v17  ;;  %v91_v40 = vadd.f32 %v90_v8, %v87_v26  ;;  %v472_v8 = vstv %s1664_s3  ;;  %s2032_s3 = sld [smem:[#allocation7 + $0x2]] }
  0xa8   :  { %v144_v50 = vadd.f32 %v143_v12, %v140_v32  ;;  %v99_v55 = vadd.f32 %v97_v33, %v91_v40  ;;  %v468_v12 = vstv %s1662_s29  ;;  %v360_v32 = vadd.f32 %v359_v61, %v355_v14  ;;  %s2029_s29 = sld [smem:[#allocation7 + $0x3]] }
  0xa9   :  { %v170_v56 = vpop.permute.xlu1 %169  ;;  %v154_v63 = vpop.permute.xlu0 %153  ;;  %v370_v33 = vstv %s1685_s26  ;;  %v484_v14 = vstv %s1699_s7  ;;  %v174_v61 = vstv %s1702_s8  ;;  %s2051_s26 = sld [smem:[#allocation7 + $0x5]]  ;;  %s2066_s7 = sld [smem:[#allocation7 + $0x7]] }
  0xaa   :  { %v148_v62 = vadd.f32 %v147_v47, %v144_v50  ;;  %v103_v17 = vadd.f32 %v102_v23, %v99_v55  ;;  %v163_v47 = vmul.f32 %v1644_v4, %v162_v53  ;;  %v200_v23 = vmul.f32 %v1323_v6, %v199_v59  ;;  %s998_s8 = sshll.u32 %s1253_s13, 4  ;;  %s999_s8 = int_to_ptr.vmem [resolvable:$true] %s998_s8 }
  0xab   :  { %v469_v55 = vmul.f32 %v468_v12, %v1310_v1  ;;  %s1221_s10 = scalar_lea.vmem %s999_s8, 1024  ;;  %p1226_p2 = scmp.lt.s32.totalorder %s999_s8, %s999_s8 }
  0xac   :  { %v156_v28 = vadd.f32 %v154_v63, %v148_v62  ;;  %v107_v31 = vadd.f32 %v106_v24, %v103_v17  ;;  %v473_v62 = vmul.f32 %v1435_v42, %v472_v8  ;;  %v303_v17 = vadd.f32 %v302_v21, %v298_v10  ;;  %p1222_p1 = scmp.ne.s32.totalorder %s999_s8, %s1221_s10  ;;  %p1227_p3 = scmp.lt.s32.totalorder %s1221_s10, %s1221_s10 }
  0xad   :  { %v252_v15 = vpop.permute.xlu1 %251  ;;  %v195_v50 = vpop.permute.xlu0 %194  ;;  %v427_v10 = vstv %s1713_s18  ;;  %s2069_s18 = sld [smem:[#allocation7 + $0x6]] }
  0xae   :  { %v160_v39 = vadd.f32 %v159_v45, %v156_v28  ;;  %v254_v40 = vadd.f32 %v252_v15, %v246_v46  ;;  %v115_v63 = vadd.f32 %v1636_v29, %v107_v31  ;;  %v197_v24 = vadd.f32 %v195_v50, %v189_v3  ;;  %p1228_p4 = por %p1227_p3, %p1226_p2 }
  0xaf   :  { %v371_v46 = vmul.f32 %v1323_v6, %v370_v33  ;;  %v314_v3 = vmul.f32 %v1323_v6, %v313_v35  ;;  %v485_v31 = vmul.f32 %v1323_v6, %v484_v14 }
  0xb0   :  { %v164_v5 = vadd.f32 %v163_v47, %v160_v39  ;;  %v1750_v45 = vadd.f32 %v257_v30, %v254_v40  ;;  %v118_v1 = vadd.f32 %v117_v25, %v115_v63  ;;  %v1757_v42 = vadd.f32 %v200_v23, %v197_v24  ;;  %p1229_p5 = pnand %p1228_p4, %p1222_p1 }
  0xb1   :  { %v366_v29 = vpop.permute.xlu1 %365  ;;  %v309_v28 = vpop.permute.xlu0 %308  ;;  %v474_v30 = vadd.f32 %v473_v62, %v469_v55  ;;  %v710_v23 = vmul.f32 %v1376_v27, %v240_v19  ;;  %v714_v40 = vmul.f32 %v1411_v34, %v244_v54  ;;  %v653_v19 = vmul.f32 %v1376_v27, %v183_v20  ;;  %v1797_v20 = vld [vmem:[%s2193_s1 + $0x70] sm:$0xff] }
  0xb2   :  { %v172_v21 = vadd.f32 %v170_v56, %v164_v5  ;;  %v368_v47 = vadd.f32 %v366_v29, %v360_v32  ;;  %v119_v15 = vmax.f32 %v118_v1, 0.0  ;;  %v311_v39 = vadd.f32 %v309_v28, %v303_v17 }
  0xb3   :  { %v428_v56 = vmul.f32 %v1323_v6, %v427_v10  ;;  %v431_v32 = vstv %s1737_s14  ;;  %v657_v54 = vmul.f32 %v1411_v34, %v187_v22  ;;  %v715_v29 = vadd.f32 %v714_v40, %v710_v23  ;;  %s2082_s14 = sld [smem:[#allocation2 + $0x1]] }
  0xb4   :  { %v175_v50 = vadd.f32 %v174_v61, %v172_v21  ;;  %v1774_v5 = vadd.f32 %v371_v46, %v368_v47  ;;  %v120_v55 = vmin.f32 %v119_v15, 20.0  ;;  %v1780_v62 = vadd.f32 %v314_v3, %v311_v39 }
  0xb5   :  { %v480_v63 = vpop.permute.xlu1 %479  ;;  %v423_v46 = vpop.permute.xlu0 %422  ;;  %v432_v3 = vmul.f32 %v1629_v36, %v431_v32  ;;  %v824_v28 = vmul.f32 %v1376_v27, %v354_v37  ;;  %v658_v15 = vadd.f32 %v657_v54, %v653_v19  ;;  %v828_v39 = vmul.f32 %v1411_v34, %v358_v38 }
  0xb6   :  { %v176_v24 = vmax.f32 %v175_v50, 0.0  ;;  %v482_v17 = vadd.f32 %v480_v63, %v474_v30  ;;  %v121_v6 = vsel %vm1724_vm0, %v120_v55, 0.0  ;;  %v425_v1 = vadd.f32 %v423_v46, %v1470_v57 }
  0xb7   :  { %v122_v22 = vpack.c.bf16 %v121_v6, %v121_v6  ;;  %v767_v23 = vmul.f32 %v1376_v27, %v297_v48  ;;  %v771_v50 = vmul.f32 %v1411_v34, %v301_v2  ;;  %v616_v38 = vmul.f32 %v1797_v20, %v146_v9 }
  0xb8   :  { %v177_v21 = vmin.f32 %v176_v24, 20.0  ;;  %v1799_v47 = vadd.f32 %v485_v31, %v482_v17  ;;  %v429_v30 = vadd.f32 %v428_v56, %v425_v1  ;;  %v559_v63 = vmul.f32 %v1797_v20, %v89_v49 }
  0xb9   :  { %v607_v57 = vpop.permute.xlu1 %606  ;;  %124 = vst.msk [vmem:[#allocation8] sm:$0xf] %vm123_vm1, %v122_v22  ;;  %v550_v40 = vpop.permute.xlu0 %549  ;;  %v726_v19 = vmul.f32 %v1430_v41, %v256_v11  ;;  %v669_v2 = vmul.f32 %v1430_v41, %v199_v59  ;;  %v829_v54 = vadd.f32 %v828_v39, %v824_v28  ;;  %v772_v24 = vadd.f32 %v771_v50, %v767_v23 }
  0xba   :  { %v178_v31 = vsel %vm1724_vm0, %v177_v21, 0.0  ;;  %v609_v37 = vadd.f32 %v607_v57, %v1453_v51  ;;  %v552_v56 = vadd.f32 %v550_v40, %v1479_v60  ;;  %v1825_v55 = vadd.f32 %v432_v3, %v429_v30 }
  0xbb   :  { %v179_v48 = vpack.c.bf16 %v178_v31, %v178_v31  ;;  %v885_v46 = vmul.f32 %v1411_v34, %v415_v44  ;;  %v203_v21 = vstv %s1819_s15  ;;  %v954_v28 = vmul.f32 %v1430_v41, %v484_v14 }
  0xbc   :  { %v613_v51 = vadd.f32 %v1458_v52, %v609_v37  ;;  %v556_v9 = vadd.f32 %v1475_v58, %v552_v56  ;;  %v938_v52 = vmul.f32 %v1376_v27, %v468_v12  ;;  %v942_v58 = vmul.f32 %v1411_v34, %v472_v8 }
  0xbd   :  { %181 = vst.msk [vmem:[#allocation8 + $0x4] sm:$0xf] %vm123_vm1, %v179_v48  ;;  %v721_v60 = vpop.permute.xlu1 %720  ;;  %v664_v11 = vpop.permute.xlu0 %663  ;;  %v881_v12 = vmul.f32 %v1376_v27, %v411_v43  ;;  %v840_v8 = vmul.f32 %v1430_v41, %v370_v33  ;;  %v783_v27 = vmul.f32 %v1430_v41, %v313_v35  ;;  %v260_v34 = vstv %s1810_s12 }
  0xbe   :  { %v723_v49 = vadd.f32 %v721_v60, %v715_v29  ;;  %v1853_v59 = vadd.f32 %v616_v38, %v613_v51  ;;  %v666_v17 = vadd.f32 %v664_v11, %v658_v15  ;;  %v1863_v6 = vadd.f32 %v559_v63, %v556_v9 }
  0xbf   :  { %v943_v22 = vadd.f32 %v942_v58, %v938_v52  ;;  %v886_v30 = vadd.f32 %v885_v46, %v881_v12  ;;  %v897_v57 = vmul.f32 %v1430_v41, %v427_v10  ;;  %v261_v15 = vmul.f32 %v1629_v36, %v260_v34 }
  0xc0   :  { %v1865_v1 = vadd.f32 %v726_v19, %v723_v49  ;;  %v1870_v29 = vadd.f32 %v669_v2, %v666_v17  ;;  %v272_v39 = vstv %s1834_s27  ;;  %v204_v14 = vmul.f32 %v1629_v36, %v203_v21 }
  0xc1   :  { %v835_v3 = vpop.permute.xlu1 %834  ;;  %v778_v44 = vpop.permute.xlu0 %777  ;;  %v215_v37 = vstv %s1844_s28  ;;  %v374_v40 = vstv %s1846_s9  ;;  %v317_v10 = vstv %s1851_s25  ;;  %v273_v48 = vmul.f32 %v272_v39, %v1305_v0 }
  0xc2   :  { %v837_v43 = vadd.f32 %v835_v3, %v829_v54  ;;  %v780_v33 = vadd.f32 %v778_v44, %v772_v24  ;;  %v386_v56 = vstv %s1861_s17  ;;  %v262_v51 = vadd.f32 %v261_v15, %v1750_v45 }
  0xc3   :  { %v216_v19 = vmul.f32 %v215_v37, %v1305_v0  ;;  %v375_v9 = vmul.f32 %v1629_v36, %v374_v40  ;;  %v205_v54 = vadd.f32 %v204_v14, %v1757_v42  ;;  %v318_v52 = vmul.f32 %v1629_v36, %v317_v10 }
  0xc4   :  { %v1884_v35 = vadd.f32 %v840_v8, %v837_v43  ;;  %v1893_v23 = vadd.f32 %v783_v27, %v780_v33  ;;  %v488_v49 = vstv %s1876_s0  ;;  %v329_v24 = vstv %s1879_s24 }
  0xc5   :  { %v949_v31 = vpop.permute.xlu1 %948  ;;  %v892_v41 = vpop.permute.xlu0 %891  ;;  %v376_v12 = vadd.f32 %v375_v9, %v1774_v5  ;;  %v387_v46 = vmul.f32 %v386_v56, %v1305_v0  ;;  %v489_v42 = vmul.f32 %v1629_v36, %v488_v49  ;;  %v319_v27 = vadd.f32 %v318_v52, %v1780_v62 }
  0xc6   :  { %v951_v50 = vadd.f32 %v949_v31, %v943_v22  ;;  %v894_v38 = vadd.f32 %v892_v41, %v886_v30  ;;  %v330_v43 = vmul.f32 %v329_v24, %v1305_v0  ;;  %v500_v44 = vstv %s1900_s21 }
  0xc7   :  { %v443_v5 = vstv %s1903_s22  ;;  %v490_v36 = vadd.f32 %v489_v42, %v1799_v47  ;;  %v447_v15 = vstv %s1918_s20  ;;  %v1962_v47 = vld [vmem:[%s2193_s1 + $0x51] sm:$0xff]  ;;  %s1975_s1 = sld [smem:[#allocation5 + $0x19]] }
  0xc8   :  { %v1909_v63 = vadd.f32 %v954_v28, %v951_v50  ;;  %v1920_v60 = vadd.f32 %v897_v57, %v894_v38  ;;  %v501_v57 = vmul.f32 %v500_v44, %v1305_v0  ;;  %v444_v14 = vmul.f32 %v443_v5, %v1305_v0 }
  0xc9   :  { %v268_v2 = vpop.permute.xlu1 %267  ;;  %v211_v11 = vpop.permute.xlu0 %210  ;;  %v730_v0 = vmul.f32 %v1797_v20, %v260_v34  ;;  %v632_v52 = vmul.f32 %v1962_v47, %v162_v53  ;;  %v917_v26 = vmul.f32 %v1962_v47, %v447_v15 }
  0xca   :  { %v270_v45 = vadd.f32 %v268_v2, %v262_v51  ;;  %v213_v58 = vadd.f32 %v211_v11, %v205_v54  ;;  %v2200_v11 = vstv %s1590_s5  ;;  %s2002_s5 = sld [smem:[#allocation5 + $0x34]] }
  0xcc   :  { %v1928_v17 = vadd.f32 %v273_v48, %v270_v45  ;;  %v1937_v8 = vadd.f32 %v216_v19, %v213_v58  ;;  %v448_v48 = vmul.f32 %v1644_v4, %v447_v15  ;;  %v575_v58 = vmul.f32 %v1962_v47, %v2200_v11 }
  0xcd   :  { %v382_v3 = vpop.permute.xlu1 %381  ;;  %v325_v33 = vpop.permute.xlu0 %324 }
  0xce   :  { %v384_v22 = vadd.f32 %v382_v3, %v376_v12  ;;  %v327_v28 = vadd.f32 %v325_v33, %v319_v27  ;;  %v731_v12 = vadd.f32 %v730_v0, %v1865_v1  ;;  %v685_v3 = vmul.f32 %v1502_v13, %v215_v37 }
  0xd0   :  { %v1943_v30 = vadd.f32 %v387_v46, %v384_v22  ;;  %v1950_v31 = vadd.f32 %v330_v43, %v327_v28  ;;  %v844_v46 = vmul.f32 %v1797_v20, %v374_v40  ;;  %v799_v43 = vmul.f32 %v1502_v13, %v329_v24 }
  0xd1   :  { %v496_v62 = vpop.permute.xlu1 %495  ;;  %v439_v41 = vpop.permute.xlu0 %438  ;;  %v958_v22 = vmul.f32 %v1797_v20, %v488_v49 }
  0xd2   :  { %v498_v50 = vadd.f32 %v496_v62, %v490_v36  ;;  %v441_v38 = vadd.f32 %v439_v41, %v1825_v55  ;;  %v673_v55 = vmul.f32 %v1797_v20, %v203_v21  ;;  %v901_v36 = vmul.f32 %v1797_v20, %v431_v32 }
  0xd3   :  { %v219_v62 = vstv %s1975_s1  ;;  %v913_v32 = vmul.f32 %v1502_v13, %v443_v5 }
  0xd4   :  { %v1964_v51 = vadd.f32 %v501_v57, %v498_v50  ;;  %v445_v19 = vadd.f32 %v444_v14, %v441_v38  ;;  %v674_v42 = vadd.f32 %v673_v55, %v1870_v29  ;;  %v856_v29 = vmul.f32 %v1502_v13, %v386_v56 }
  0xd5   :  { %v623_v9 = vpop.permute.xlu1 %622  ;;  %v566_v54 = vpop.permute.xlu0 %565  ;;  %v276_v57 = vstv %s1972_s2  ;;  %v970_v14 = vmul.f32 %v1502_v13, %v500_v44  ;;  %v220_v0 = vmul.f32 %v1644_v4, %v219_v62  ;;  %v390_v44 = vstv %s2002_s5 }
  0xd6   :  { %v625_v2 = vadd.f32 %v623_v9, %v1853_v59  ;;  %v568_v45 = vadd.f32 %v566_v54, %v1863_v6  ;;  %v1981_v34 = vadd.f32 %v448_v48, %v445_v19  ;;  %v742_v59 = vmul.f32 %v1502_v13, %v272_v39 }
  0xd7   :  { %v902_v48 = vadd.f32 %v901_v36, %v1920_v60  ;;  %v333_v9 = vstv %s2004_s16  ;;  %v391_v60 = vmul.f32 %v1644_v4, %v390_v44  ;;  %v221_v11 = vadd.f32 %v220_v0, %v1937_v8 }
  0xd8   :  { %v629_v21 = vadd.f32 %v1509_v16, %v625_v2  ;;  %v572_v53 = vadd.f32 %v1518_v18, %v568_v45  ;;  %v787_v16 = vmul.f32 %v1797_v20, %v317_v10  ;;  %v845_v10 = vadd.f32 %v844_v46, %v1884_v35 }
  0xd9   :  { %v737_v6 = vpop.permute.xlu1 %736  ;;  %v680_v39 = vpop.permute.xlu0 %679  ;;  %v277_v20 = vmul.f32 %v1644_v4, %v276_v57  ;;  %v504_v2 = vstv %s2020_s30 }
  0xda   :  { %v739_v1 = vadd.f32 %v737_v6, %v731_v12  ;;  %v2006_v40 = vadd.f32 %v632_v52, %v629_v21  ;;  %v682_v18 = vadd.f32 %v680_v39, %v674_v42  ;;  %v2011_v27 = vadd.f32 %v575_v58, %v572_v53 }
  0xdb   :  { %v788_v56 = vadd.f32 %v787_v16, %v1893_v23  ;;  %v959_v23 = vadd.f32 %v958_v22, %v1909_v63  ;;  %v278_v55 = vadd.f32 %v277_v20, %v1928_v17  ;;  %v288_v52 = vstv %s2029_s29 }
  0xdc   :  { %v2013_v37 = vadd.f32 %v742_v59, %v739_v1  ;;  %v2022_v33 = vadd.f32 %v685_v3, %v682_v18  ;;  %v334_v58 = vmul.f32 %v1644_v4, %v333_v9  ;;  %v231_v12 = vstv %s2032_s3 }
  0xdd   :  { %v851_v28 = vpop.permute.xlu1 %850  ;;  %v794_v24 = vpop.permute.xlu0 %793  ;;  %v392_v53 = vadd.f32 %v391_v60, %v1943_v30  ;;  %v505_v6 = vmul.f32 %v1644_v4, %v504_v2  ;;  %v402_v42 = vstv %s2051_s26  ;;  %v345_v18 = vstv %s2054_s19 }
  0xde   :  { %v853_v35 = vadd.f32 %v851_v28, %v845_v10  ;;  %v796_v49 = vadd.f32 %v794_v24, %v788_v56  ;;  %v335_v16 = vadd.f32 %v334_v58, %v1950_v31  ;;  %v516_v31 = vstv %s2066_s7 }
  0xdf   :  { %v506_v22 = vadd.f32 %v505_v6, %v1964_v51 }
  0xe0   :  { %v2037_v50 = vadd.f32 %v856_v29, %v853_v35  ;;  %v2044_v41 = vadd.f32 %v799_v43, %v796_v49  ;;  %v746_v35 = vmul.f32 %v1962_v47, %v276_v57 }
  0xe1   :  { %v965_v38 = vpop.permute.xlu1 %964  ;;  %v908_v63 = vpop.permute.xlu0 %907 }
  0xe2   :  { %v967_v19 = vadd.f32 %v965_v38, %v959_v23  ;;  %v910_v13 = vadd.f32 %v908_v63, %v902_v48  ;;  %v459_v23 = vstv %s2069_s18  ;;  %v689_v63 = vmul.f32 %v1962_v47, %v219_v62 }
  0xe4   :  { %v2056_v5 = vadd.f32 %v970_v14, %v967_v19  ;;  %v2061_v54 = vadd.f32 %v913_v32, %v910_v13 }
  0xe5   :  { %v284_v45 = vpop.permute.xlu1 %283  ;;  %v227_v17 = vpop.permute.xlu0 %226 }
  0xe6   :  { %v286_v21 = vadd.f32 %v284_v45, %v278_v55  ;;  %v229_v59 = vadd.f32 %v227_v17, %v221_v11  ;;  %v860_v45 = vmul.f32 %v1962_v47, %v390_v44  ;;  %v803_v11 = vmul.f32 %v1962_v47, %v333_v9 }
  0xe8   :  { %v289_v46 = vadd.f32 %v288_v52, %v286_v21  ;;  %v232_v8 = vadd.f32 %v231_v12, %v229_v59  ;;  %v525_v21 = vstv %s2082_s14 }
  0xe9   :  { %v398_v3 = vpop.permute.xlu1 %397  ;;  %v341_v29 = vpop.permute.xlu0 %340  ;;  %vm2129_vm2 = vcmp.lt.s32.totalorder %v1647_v7, %v525_v21 }
  0xea   :  { %v290_v1 = vmax.f32 %v289_v46, 0.0  ;;  %v400_v39 = vadd.f32 %v398_v3, %v392_v53  ;;  %v233_v10 = vmax.f32 %v232_v8, 0.0  ;;  %v343_v30 = vadd.f32 %v341_v29, %v335_v16 }
  0xeb   :  { %v747_v3 = vadd.f32 %v746_v35, %v2013_v37  ;;  %v974_v29 = vmul.f32 %v1962_v47, %v504_v2 }
  0xec   :  { %v291_v43 = vmin.f32 %v290_v1, 20.0  ;;  %v403_v4 = vadd.f32 %v402_v42, %v400_v39  ;;  %v234_v28 = vmin.f32 %v233_v10, 20.0  ;;  %v346_v56 = vadd.f32 %v345_v18, %v343_v30 }
  0xed   :  { %v512_v36 = vpop.permute.xlu1 %511  ;;  %v455_v32 = vpop.permute.xlu0 %454  ;;  %v690_v39 = vadd.f32 %v689_v63, %v2022_v33  ;;  %v975_v15 = vadd.f32 %v974_v29, %v2056_v5 }
  0xee   :  { %v292_v24 = vsel %vm1724_vm0, %v291_v43, 0.0  ;;  %v404_v49 = vmax.f32 %v403_v4, 0.0  ;;  %v514_v14 = vadd.f32 %v512_v36, %v506_v22  ;;  %v235_v51 = vsel %vm1724_vm0, %v234_v28, 0.0 }
  0xef   :  { %v293_v20 = vpack.c.bf16 %v292_v24, %v292_v24  ;;  %v347_v38 = vmax.f32 %v346_v56, 0.0  ;;  %v457_v48 = vadd.f32 %v455_v32, %v1981_v34  ;;  %v236_v0 = vpack.c.bf16 %v235_v51, %v235_v51 }
  0xf0   :  { %v405_v19 = vmin.f32 %v404_v49, 20.0  ;;  %v517_v57 = vadd.f32 %v516_v31, %v514_v14  ;;  %v861_v56 = vadd.f32 %v860_v45, %v2037_v50  ;;  %v804_v24 = vadd.f32 %v803_v11, %v2044_v41 }
  0xf1   :  { %295 = vst.msk [vmem:[#allocation8 + $0xc] sm:$0xf] %vm123_vm1, %v293_v20  ;;  %v348_v13 = vmin.f32 %v347_v38, 20.0  ;;  %v460_v55 = vadd.f32 %v459_v23, %v457_v48  ;;  %v639_v60 = vpop.permute.xlu1 %638  ;;  %238 = vst.msk [vmem:[#allocation8 + $0x8] sm:$0xf] %vm123_vm1, %v236_v0  ;;  %v582_v17 = vpop.permute.xlu0 %581 }
  0xf2   :  { %v406_v34 = vsel %vm1724_vm0, %v405_v19, 0.0  ;;  %v518_v58 = vmax.f32 %v517_v57, 0.0  ;;  %v641_v62 = vadd.f32 %v639_v60, %v2006_v40  ;;  %v584_v44 = vadd.f32 %v582_v17, %v2011_v27 }
  0xf3   :  { %v407_v59 = vpack.c.bf16 %v406_v34, %v406_v34  ;;  %v349_v46 = vsel %vm1724_vm0, %v348_v13, 0.0  ;;  %v461_v53 = vmax.f32 %v460_v55, 0.0  ;;  %v918_v57 = vadd.f32 %v917_v26, %v2061_v54 }
  0xf4   :  { %v350_v9 = vpack.c.bf16 %v349_v46, %v349_v46  ;;  %v519_v6 = vmin.f32 %v518_v58, 20.0  ;;  %v644_v8 = vadd.f32 %v641_v62, %v174_v61  ;;  %v587_v1 = vadd.f32 %v584_v44, %v117_v25 }
  0xf5   :  { %409 = vst.msk [vmem:[#allocation8 + $0x14] sm:$0xf] %vm123_vm1, %v407_v59  ;;  %v462_v16 = vmin.f32 %v461_v53, 20.0  ;;  %v753_v40 = vpop.permute.xlu1 %752  ;;  %v696_v10 = vpop.permute.xlu0 %695 }
  0xf6   :  { %352 = vst.msk [vmem:[#allocation8 + $0x10] sm:$0xf] %vm123_vm1, %v350_v9  ;;  %v520_v61 = vsel %vm1724_vm0, %v519_v6, 0.0  ;;  %v645_v37 = vmax.f32 %v644_v8, 0.0  ;;  %v755_v25 = vadd.f32 %v753_v40, %v747_v3  ;;  %v588_v2 = vmax.f32 %v587_v1, 0.0 }
  0xf7   :  { %v521_v30 = vpack.c.bf16 %v520_v61, %v520_v61  ;;  %v463_v33 = vsel %vm1724_vm0, %v462_v16, 0.0  ;;  %v698_v43 = vadd.f32 %v696_v10, %v690_v39 }
  0xf8   :  { %v464_v4 = vpack.c.bf16 %v463_v33, %v463_v33  ;;  %v646_v22 = vmin.f32 %v645_v37, 20.0  ;;  %v758_v28 = vadd.f32 %v755_v25, %v288_v52  ;;  %v589_v7 = vmin.f32 %v588_v2, 20.0 }
  0xf9   :  { %523 = vst.msk [vmem:[#allocation8 + $0x1c] sm:$0xf] %vm123_vm1, %v521_v30  ;;  %v701_v36 = vadd.f32 %v698_v43, %v231_v12  ;;  %v867_v35 = vpop.permute.xlu1 %866  ;;  %v810_v14 = vpop.permute.xlu0 %809 }
  0xfa   :  { %466 = vst.msk [vmem:[#allocation8 + $0x18] sm:$0xf] %vm123_vm1, %v464_v4  ;;  %v647_v52 = vsel %vm2129_vm2, %v646_v22, 0.0  ;;  %v759_v49 = vmax.f32 %v758_v28, 0.0  ;;  %v869_v50 = vadd.f32 %v867_v35, %v861_v56  ;;  %v590_v20 = vsel %vm2129_vm2, %v589_v7, 0.0 }
  0xfb   :  { %v648_v32 = vpack.c.bf16 %v647_v52, %v647_v52  ;;  %v702_v12 = vmax.f32 %v701_v36, 0.0  ;;  %v812_v51 = vadd.f32 %v810_v14, %v804_v24  ;;  %v591_v38 = vpack.c.bf16 %v590_v20, %v590_v20 }
  0xfc   :  { %v760_v41 = vmin.f32 %v759_v49, 20.0  ;;  %v872_v48 = vadd.f32 %v869_v50, %v402_v42 }
  0xfd   :  { %650 = vst.msk [vmem:[#allocation8 + $0x24] sm:$0xf] %vm123_vm1, %v648_v32  ;;  %v703_v47 = vmin.f32 %v702_v12, 20.0  ;;  %v815_v0 = vadd.f32 %v812_v51, %v345_v18  ;;  %v981_v19 = vpop.permute.xlu1 %980  ;;  %593 = vst.msk [vmem:[#allocation8 + $0x20] sm:$0xf] %vm123_vm1, %v591_v38  ;;  %v924_v42 = vpop.permute.xlu0 %923 }
  0xfe   :  { %v761_v63 = vsel %vm2129_vm2, %v760_v41, 0.0  ;;  %v873_v13 = vmax.f32 %v872_v48, 0.0  ;;  %v983_v55 = vadd.f32 %v981_v19, %v975_v15  ;;  %v926_v11 = vadd.f32 %v924_v42, %v918_v57 }
  0xff   :  { %v762_v60 = vpack.c.bf16 %v761_v63, %v761_v63  ;;  %v704_v5 = vsel %vm2129_vm2, %v703_v47, 0.0  ;;  %v816_v45 = vmax.f32 %v815_v0, 0.0 }
 0x100   :  { %v705_v34 = vpack.c.bf16 %v704_v5, %v704_v5  ;;  %v874_v18 = vmin.f32 %v873_v13, 20.0  ;;  %v986_v58 = vadd.f32 %v983_v55, %v516_v31  ;;  %v929_v21 = vadd.f32 %v926_v11, %v459_v23 }
 0x101   :  { %764 = vst.msk [vmem:[#allocation8 + $0x2c] sm:$0xf] %vm123_vm1, %v762_v60  ;;  %v817_v54 = vmin.f32 %v816_v45, 20.0 }
 0x102   :  { %707 = vst.msk [vmem:[#allocation8 + $0x28] sm:$0xf] %vm123_vm1, %v705_v34  ;;  %v875_v62 = vsel %vm2129_vm2, %v874_v18, 0.0  ;;  %v987_v17 = vmax.f32 %v986_v58, 0.0  ;;  %v930_v53 = vmax.f32 %v929_v21, 0.0 }
 0x103   :  { %v876_v59 = vpack.c.bf16 %v875_v62, %v875_v62  ;;  %v818_v46 = vsel %vm2129_vm2, %v817_v54, 0.0 }
 0x104   :  { %v819_v44 = vpack.c.bf16 %v818_v46, %v818_v46  ;;  %v988_v9 = vmin.f32 %v987_v17, 20.0  ;;  %v931_v31 = vmin.f32 %v930_v53, 20.0 }
 0x105   :  { %878 = vst.msk [vmem:[#allocation8 + $0x34] sm:$0xf] %vm123_vm1, %v876_v59 }
 0x106   :  { %821 = vst.msk [vmem:[#allocation8 + $0x30] sm:$0xf] %vm123_vm1, %v819_v44  ;;  %v989_v23 = vsel %vm2129_vm2, %v988_v9, 0.0  ;;  %v932_v8 = vsel %vm2129_vm2, %v931_v31, 0.0 }
 0x107   :  { %v990_v6 = vpack.c.bf16 %v989_v23, %v989_v23  ;;  %v933_v3 = vpack.c.bf16 %v932_v8, %v932_v8 }
 0x109   :  { %992 = vst.msk [vmem:[#allocation8 + $0x3c] sm:$0xf] %vm123_vm1, %v990_v6  ;;  %935 = vst.msk [vmem:[#allocation8 + $0x38] sm:$0xf] %vm123_vm1, %v933_v3 }
 0x10a   :  { %1232 = shalt.err (!%p1229_p5)
}
 0x10b   :  { %s1233_s15 = scalar_lea.hbm %s2196_s4, 1024 }
 0x10c   :  { %p1234_p6 = scmp.ne.s32.totalorder %s2196_s4, %s1233_s15  ;;  %p1237_p7 = scmp.lt.u32.totalorder %s1233_s15, %s2196_s4 }
 0x10e   :  { %p1239_p8 = pnand %p1237_p7, %p1234_p6 }
 0x110   :  { %1242 = shalt.err (!%p1239_p8)
}
 0x111   :  { %s1254_s17 = smov 64   ;;  %s1255_s0 = smov 4  }
 0x112   :  { %1004 = dma.vmem_to_hbm [thread:$0]  %s999_s8, 1024, %s2196_s4, [#allocation3], %s1254_s17, %s1254_s17, %s1255_s0  }
 0x113   :  { %1247 = dma.done.wait [#allocation3], 1024  }
 0x114   :  { %1248 = vsyncadd [#allocation3], 4294966272 }
 0x115   :  { %1008 = vsyncpa [#allocation3], 1 }
 0x116   :  { %1009 = vsyncpa [#allocation4], 1 }
 0x117   :  { %1010 = vsyncpa [#allocation6], 1 }

</bundles_post_ra>
